<compile_context>
chip_gen: v6e
topology: v6e:2x2x1
jax: 0.10.0
libtpu: 0.0.40
codegen_flags: <defaults>
</compile_context>

<pallas_src>
import jax
import jax.numpy as jnp
from jax import lax
from jax.experimental import pallas as pl
from jax.experimental.pallas import tpu as pltpu

HIDDEN = 32
NUMCLASSES = 3
DENSE1 = 100
DENSE1_PAD = 128


def bilstm_kernel(x_ref,
                  wih_f_ref, wih_r_ref, b_ref, whh_ref,
                  w1_ref, b1_ref, w2_ref, b2_ref,
                  out_ref):
    B, T = x_ref.shape
    H2 = whh_ref.shape[0]            # 2H (fused fwd+rev hidden width)
    H = H2 // 2
    C = out_ref.shape[1]

    x = x_ref[...]                   # (B, T)
    wih_f = wih_f_ref[...]           # (1, 8H)  fwd gate lanes populated, rev lanes 0
    wih_r = wih_r_ref[...]           # (1, 8H)  rev gate lanes populated, fwd lanes 0
    b = b_ref[...]                   # (1, 8H)  both directions' biases
    whh = whh_ref[...]               # (2H, 8H) block-diagonal recurrent weight

    h = jnp.zeros((B, H2), jnp.float32)      # [h_f | h_r]
    c = jnp.zeros((B, H2), jnp.float32)      # [c_f | c_r]

    # Fully-unrolled fused bidirectional recurrence.
    # Gate lane layout: [i_f|i_r | f_f|f_r | g_f|g_r | o_f|o_r], each block H wide.
    h_steps = []
    for i in range(T):
        # In-loop input projection: 2 broadcast FMAs + bias (idle VALU slots).
        xw = x[:, i:i + 1] * wih_f + x[:, T - 1 - i:T - i] * wih_r + b
        # TODO(synk): matmul_push_rhs-resident whh instead of re-streaming per step.
        gates = xw + jnp.dot(h, whh, preferred_element_type=jnp.float32)   # (B, 8H)

        lo_half = gates[:, :2 * H2]        # [i | f] blocks, vreg-aligned (4H = 128 lanes)
        hi_half = gates[:, 2 * H2:]        # [g | o] blocks
        sg_lo = jax.nn.sigmoid(lo_half)    # 3 EUP passes total instead of 4
        tg_hi = jnp.tanh(hi_half)
        sg_hi = jax.nn.sigmoid(hi_half)

        i_g = sg_lo[:, :H2]
        f_g = sg_lo[:, H2:]
        g_g = tg_hi[:, :H2]
        o_g = sg_hi[:, H2:]

        c = f_g * c + i_g * g_g
        h = o_g * jnp.tanh(c)
        h_steps.append(h)                  # stays in vregs (no VMEM scratch)

    # Assemble (T*B, 2H) hidden slab: row block t = [h_f(step t) | h_r(step T-1-t)].
    lane = lax.broadcasted_iota(jnp.int32, (B, H2), 1)
    fwd_mask = lane < H
    lo = jnp.concatenate(
        [jnp.where(fwd_mask, h_steps[t], h_steps[T - 1 - t]) for t in range(T)],
        axis=0)                                                       # (T*B, 2H)

    # Batched dense head over all T*B time/batch rows (2 matmuls total).
    d1 = jnp.maximum(
        jnp.dot(lo, w1_ref[...], preferred_element_type=jnp.float32) + b1_ref[...],
        0.0)                                                          # (T*B, 128)
    d2 = jnp.dot(d1, w2_ref[...], preferred_element_type=jnp.float32) + b2_ref[...]
    m = jnp.max(d2, axis=-1, keepdims=True)
    e = jnp.exp(d2 - m)
    p = e * pl.reciprocal(jnp.sum(e, axis=-1, keepdims=True), approx=True)  # (T*B, C)

    # Mean over the sequence dimension: one strided reduce over the leading axis.
    out_ref[...] = p.reshape(T, B, C).sum(axis=0) * (1.0 / T)


def pack_params(params):
    """Rearrange natural-layout params into the fused / padded kernel layout."""
    H = HIDDEN

    def interleave(wf, wr):
        # (K, 4H) x2 -> (K, 8H) with per-gate [fwd | rev] lane blocks.
        cols = []
        for g in range(4):
            cols.append(wf[:, g * H:(g + 1) * H])
            cols.append(wr[:, g * H:(g + 1) * H])
        return jnp.concatenate(cols, axis=1)

    z1 = jnp.zeros((1, 4 * H), jnp.float32)
    zh = jnp.zeros((H, 4 * H), jnp.float32)

    wih_fi = interleave(params["wih_f"], z1)            # (1, 8H)
    wih_ri = interleave(z1, params["wih_r"])            # (1, 8H)
    b_i = interleave(params["b_f"], params["b_r"])      # (1, 8H)
    whh_bd = jnp.concatenate(
        [interleave(params["whh_f"], zh),               # rows driven by h_f
         interleave(zh, params["whh_r"])], axis=0)      # rows driven by h_r -> (2H, 8H)

    # Dense layers, zero-padded DENSE1 -> 128 (exact: ReLU keeps padded lanes 0
    # and the padded w2 rows are 0).
    w1p = jnp.zeros((2 * H, DENSE1_PAD), jnp.float32).at[:, :DENSE1].set(params["w1"])
    b1p = jnp.zeros((1, DENSE1_PAD), jnp.float32).at[:, :DENSE1].set(params["b1"])
    w2p = jnp.zeros((DENSE1_PAD, NUMCLASSES), jnp.float32).at[:DENSE1, :].set(params["w2"])

    return dict(wih_fi=wih_fi, wih_ri=wih_ri, b_i=b_i, whh_bd=whh_bd,
                w1p=w1p, b1p=b1p, w2p=w2p, b2=params["b2"])


def _const_spec(shape):
    nd = len(shape)
    return pl.BlockSpec(shape, lambda i, _nd=nd: (0,) * _nd)


def bilstm_forward(x, kparams, block_b=8):
    B, T = x.shape
    if B % block_b != 0:
        block_b = B                   # tiny / ragged batches: single block
    H2 = 2 * HIDDEN
    G = 8 * HIDDEN

    args = (x,
            kparams["wih_fi"], kparams["wih_ri"], kparams["b_i"], kparams["whh_bd"],
            kparams["w1p"], kparams["b1p"], kparams["w2p"], kparams["b2"])

    in_specs = [
        pl.BlockSpec((block_b, T), lambda i: (i, 0)),   # x: batch-blocked
        _const_spec((1, G)),                            # wih_fi
        _const_spec((1, G)),                            # wih_ri
        _const_spec((1, G)),                            # b_i
        _const_spec((H2, G)),                           # whh_bd
        _const_spec((H2, DENSE1_PAD)),                  # w1p
        _const_spec((1, DENSE1_PAD)),                   # b1p
        _const_spec((DENSE1_PAD, NUMCLASSES)),          # w2p
        _const_spec((1, NUMCLASSES)),                   # b2
    ]

    # Batch-parallel grid: one batch block per grid step; on v7x larger batches
    # shard across both TensorCores. All weights + activations are far under
    # every generation's VMEM budget, so no further tiling is needed.
    return pl.pallas_call(
        bilstm_kernel,
        out_shape=jax.ShapeDtypeStruct((B, NUMCLASSES), jnp.float32),
        grid=(B // block_b,),
        in_specs=in_specs,
        out_specs=pl.BlockSpec((block_b, NUMCLASSES), lambda i: (i, 0)),
        compiler_params=pltpu.CompilerParams(dimension_semantics=("parallel",)),
    )(*args)


def reference_forward(x, params):
    """Pure-JAX reference mirroring the PyTorch forward (eval mode)."""
    B, T = x.shape
    H = HIDDEN

    def cell(carry, x_t, wih, whh, b):
        h, c = carry
        gates = x_t[:, None] * wih + h @ whh + b
        i = jax.nn.sigmoid(gates[:, :H])
        f = jax.nn.sigmoid(gates[:, H:2 * H])
        g = jnp.tanh(gates[:, 2 * H:3 * H])
        o = jax.nn.sigmoid(gates[:, 3 * H:])
        c = f * c + i * g
        h = o * jnp.tanh(c)
        return (h, c), h

    h0 = jnp.zeros((B, H), jnp.float32)
    c0 = jnp.zeros((B, H), jnp.float32)
    xs = x.T                                   # (T, B)
    _, hs_f = lax.scan(
        lambda carry, xt: cell(carry, xt, params["wih_f"], params["whh_f"], params["b_f"]),
        (h0, c0), xs)
    _, hs_r = lax.scan(
        lambda carry, xt: cell(carry, xt, params["wih_r"], params["whh_r"], params["b_r"]),
        (h0, c0), xs[::-1])
    hs_r = hs_r[::-1]
    lo = jnp.concatenate([hs_f, hs_r], axis=-1)               # (T, B, 2H)
    d1 = jnp.maximum(jnp.einsum("tbh,hd->tbd", lo, params["w1"]) + params["b1"], 0.0)
    d2 = jnp.einsum("tbh,hd->tbd", d1, params["w2"]) + params["b2"]
    p = jax.nn.softmax(d2, axis=-1)
    return p.mean(axis=0)                                     # (B, C)


def init_params(key):
    H = HIDDEN
    ks = jax.random.split(key, 12)
    k_lstm = 1.0 / jnp.sqrt(H)
    k_d1 = 1.0 / jnp.sqrt(2 * H)
    k_d2 = 1.0 / jnp.sqrt(DENSE1)

    def u(k, shape, bound):
        return jax.random.uniform(k, shape, jnp.float32, -bound, bound)

    params = {
        # LSTM weights, pre-transposed: wih (1,4H), whh (H,4H), b = b_ih+b_hh (1,4H)
        "wih_f": u(ks[0], (1, 4 * H), k_lstm),
        "whh_f": u(ks[1], (H, 4 * H), k_lstm),
        "b_f":   u(ks[2], (1, 4 * H), k_lstm) + u(ks[3], (1, 4 * H), k_lstm),
        "wih_r": u(ks[4], (1, 4 * H), k_lstm),
        "whh_r": u(ks[5], (H, 4 * H), k_lstm),
        "b_r":   u(ks[6], (1, 4 * H), k_lstm) + u(ks[7], (1, 4 * H), k_lstm),
        # dense layers, pre-transposed for (B,K)@(K,N)
        "w1": u(ks[8], (2 * H, DENSE1), k_d1),
        "b1": u(ks[9], (1, DENSE1), k_d1),
        "w2": u(ks[10], (DENSE1, NUMCLASSES), k_d2),
        "b2": u(ks[11], (1, NUMCLASSES), k_d2),
    }
    return params


if __name__ == "__main__":
    key = jax.random.PRNGKey(0)
    k_param, k_x = jax.random.split(key)
    params = init_params(k_param)
    kparams = pack_params(params)

    # B=8 fills the f32 sublane tile (8 rows per vreg / per MXU op) — per review.
    B, T = 8, 8
    x = jax.random.normal(k_x, (B, T), jnp.float32)

    out = jax.block_until_ready(bilstm_forward(x, kparams))

    ref = reference_forward(x, params)
    assert out.shape == (B, NUMCLASSES)
    # Tolerance relaxed slightly vs. the pure-f32 path because the softmax
    # denominator now uses the approximate EUP reciprocal.
    assert jnp.allclose(out, ref, atol=2e-3, rtol=2e-3), (out, ref)
    print("KERNEL_OK")
</pallas_src>

<mosaic_0001>
module attributes {stable_mosaic.version = 11 : i64} {
  func.func @bilstm_kernel(%arg0: i32, %arg1: memref<8x8xf32, #tpu.memory_space<vmem>>, %arg2: memref<1x256xf32, #tpu.memory_space<vmem>>, %arg3: memref<1x256xf32, #tpu.memory_space<vmem>>, %arg4: memref<1x256xf32, #tpu.memory_space<vmem>>, %arg5: memref<64x256xf32, #tpu.memory_space<vmem>>, %arg6: memref<64x128xf32, #tpu.memory_space<vmem>>, %arg7: memref<1x128xf32, #tpu.memory_space<vmem>>, %arg8: memref<128x3xf32, #tpu.memory_space<vmem>>, %arg9: memref<1x3xf32, #tpu.memory_space<vmem>>, %arg10: memref<8x3xf32, #tpu.memory_space<vmem>>) attributes {dimension_semantics = [#tpu.dimension_semantics<parallel>], iteration_bounds = array<i64: 1>, scalar_prefetch = 0 : i64, scratch_operands = 0 : i64, tpu.core_type = #tpu.core_type<tc>, window_params = [{transform_indices = @transform_0, window_bounds = array<i64: 8, 8>}, {pipeline_mode = #tpu.pipeline_mode<synchronous>, transform_indices = @transform_1, window_bounds = array<i64: 1, 256>}, {pipeline_mode = #tpu.pipeline_mode<synchronous>, transform_indices = @transform_2, window_bounds = array<i64: 1, 256>}, {pipeline_mode = #tpu.pipeline_mode<synchronous>, transform_indices = @transform_3, window_bounds = array<i64: 1, 256>}, {pipeline_mode = #tpu.pipeline_mode<synchronous>, transform_indices = @transform_4, window_bounds = array<i64: 64, 256>}, {pipeline_mode = #tpu.pipeline_mode<synchronous>, transform_indices = @transform_5, window_bounds = array<i64: 64, 128>}, {pipeline_mode = #tpu.pipeline_mode<synchronous>, transform_indices = @transform_6, window_bounds = array<i64: 1, 128>}, {pipeline_mode = #tpu.pipeline_mode<synchronous>, transform_indices = @transform_7, window_bounds = array<i64: 128, 3>}, {pipeline_mode = #tpu.pipeline_mode<synchronous>, transform_indices = @transform_8, window_bounds = array<i64: 1, 3>}, {transform_indices = @transform_9, window_bounds = array<i64: 8, 3>}]} {
    %c0 = arith.constant 0 : index
    %c0_0 = arith.constant 0 : index
    %0 = vector.load %arg1[%c0, %c0_0] : memref<8x8xf32, #tpu.memory_space<vmem>>, vector<8x8xf32>
    %c0_1 = arith.constant 0 : index
    %c0_2 = arith.constant 0 : index
    %1 = vector.load %arg2[%c0_1, %c0_2] : memref<1x256xf32, #tpu.memory_space<vmem>>, vector<1x256xf32>
    %c0_3 = arith.constant 0 : index
    %c0_4 = arith.constant 0 : index
    %2 = vector.load %arg3[%c0_3, %c0_4] : memref<1x256xf32, #tpu.memory_space<vmem>>, vector<1x256xf32>
    %c0_5 = arith.constant 0 : index
    %c0_6 = arith.constant 0 : index
    %3 = vector.load %arg4[%c0_5, %c0_6] : memref<1x256xf32, #tpu.memory_space<vmem>>, vector<1x256xf32>
    %c0_7 = arith.constant 0 : index
    %c0_8 = arith.constant 0 : index
    %4 = vector.load %arg5[%c0_7, %c0_8] : memref<64x256xf32, #tpu.memory_space<vmem>>, vector<64x256xf32>
    %cst = arith.constant 0.000000e+00 : f32
    %5 = vector.broadcast %cst : f32 to vector<8x64xf32>
    %cst_9 = arith.constant 0.000000e+00 : f32
    %6 = vector.broadcast %cst_9 : f32 to vector<8x64xf32>
    %7 = vector.extract_strided_slice %0 {offsets = [0, 0], sizes = [8, 1], strides = [1, 1]} : vector<8x8xf32> to vector<8x1xf32>
    %8 = vector.broadcast %7 : vector<8x1xf32> to vector<8x256xf32>
    %9 = vector.broadcast %1 : vector<1x256xf32> to vector<8x256xf32>
    %10 = arith.mulf %8, %9 : vector<8x256xf32>
    %11 = vector.extract_strided_slice %0 {offsets = [0, 7], sizes = [8, 1], strides = [1, 1]} : vector<8x8xf32> to vector<8x1xf32>
    %12 = vector.broadcast %11 : vector<8x1xf32> to vector<8x256xf32>
    %13 = vector.broadcast %2 : vector<1x256xf32> to vector<8x256xf32>
    %14 = arith.mulf %12, %13 : vector<8x256xf32>
    %15 = arith.addf %10, %14 : vector<8x256xf32>
    %16 = vector.broadcast %3 : vector<1x256xf32> to vector<8x256xf32>
    %17 = arith.addf %15, %16 : vector<8x256xf32>
    %cst_10 = arith.constant dense<0.000000e+00> : vector<8x256xf32>
    %18 = tpu.matmul %5, %4, %cst_10 {dimension_numbers = #tpu.dot_dimension_numbers<[1], [0], [0], [1], [0, 0, 1, 1], [], []>} : vector<8x64xf32>, vector<64x256xf32>, vector<8x256xf32> -> vector<8x256xf32>
    %19 = arith.addf %17, %18 : vector<8x256xf32>
    %20 = vector.extract_strided_slice %19 {offsets = [0, 0], sizes = [8, 128], strides = [1, 1]} : vector<8x256xf32> to vector<8x128xf32>
    %21 = vector.extract_strided_slice %19 {offsets = [0, 128], sizes = [8, 128], strides = [1, 1]} : vector<8x256xf32> to vector<8x128xf32>
    %22 = arith.negf %20 : vector<8x128xf32>
    %23 = math.exp %22 : vector<8x128xf32>
    %cst_11 = arith.constant 1.000000e+00 : f32
    %24 = vector.broadcast %cst_11 : f32 to vector<8x128xf32>
    %25 = arith.addf %24, %23 : vector<8x128xf32>
    %26 = arith.divf %24, %25 : vector<8x128xf32>
    %27 = math.tanh %21 : vector<8x128xf32>
    %28 = arith.negf %21 : vector<8x128xf32>
    %29 = math.exp %28 : vector<8x128xf32>
    %cst_12 = arith.constant 1.000000e+00 : f32
    %30 = vector.broadcast %cst_12 : f32 to vector<8x128xf32>
    %31 = arith.addf %30, %29 : vector<8x128xf32>
    %32 = arith.divf %30, %31 : vector<8x128xf32>
    %33 = vector.extract_strided_slice %26 {offsets = [0, 0], sizes = [8, 64], strides = [1, 1]} : vector<8x128xf32> to vector<8x64xf32>
    %34 = vector.extract_strided_slice %26 {offsets = [0, 64], sizes = [8, 64], strides = [1, 1]} : vector<8x128xf32> to vector<8x64xf32>
    %35 = vector.extract_strided_slice %27 {offsets = [0, 0], sizes = [8, 64], strides = [1, 1]} : vector<8x128xf32> to vector<8x64xf32>
    %36 = vector.extract_strided_slice %32 {offsets = [0, 64], sizes = [8, 64], strides = [1, 1]} : vector<8x128xf32> to vector<8x64xf32>
    %37 = arith.mulf %34, %6 : vector<8x64xf32>
    %38 = arith.mulf %33, %35 : vector<8x64xf32>
    %39 = arith.addf %37, %38 : vector<8x64xf32>
    %40 = math.tanh %39 : vector<8x64xf32>
    %41 = arith.mulf %36, %40 : vector<8x64xf32>
    %42 = vector.extract_strided_slice %0 {offsets = [0, 1], sizes = [8, 1], strides = [1, 1]} : vector<8x8xf32> to vector<8x1xf32>
    %43 = vector.broadcast %42 : vector<8x1xf32> to vector<8x256xf32>
    %44 = vector.broadcast %1 : vector<1x256xf32> to vector<8x256xf32>
    %45 = arith.mulf %43, %44 : vector<8x256xf32>
    %46 = vector.extract_strided_slice %0 {offsets = [0, 6], sizes = [8, 1], strides = [1, 1]} : vector<8x8xf32> to vector<8x1xf32>
    %47 = vector.broadcast %46 : vector<8x1xf32> to vector<8x256xf32>
    %48 = vector.broadcast %2 : vector<1x256xf32> to vector<8x256xf32>
    %49 = arith.mulf %47, %48 : vector<8x256xf32>
    %50 = arith.addf %45, %49 : vector<8x256xf32>
    %51 = vector.broadcast %3 : vector<1x256xf32> to vector<8x256xf32>
    %52 = arith.addf %50, %51 : vector<8x256xf32>
    %cst_13 = arith.constant dense<0.000000e+00> : vector<8x256xf32>
    %53 = tpu.matmul %41, %4, %cst_13 {dimension_numbers = #tpu.dot_dimension_numbers<[1], [0], [0], [1], [0, 0, 1, 1], [], []>} : vector<8x64xf32>, vector<64x256xf32>, vector<8x256xf32> -> vector<8x256xf32>
    %54 = arith.addf %52, %53 : vector<8x256xf32>
    %55 = vector.extract_strided_slice %54 {offsets = [0, 0], sizes = [8, 128], strides = [1, 1]} : vector<8x256xf32> to vector<8x128xf32>
    %56 = vector.extract_strided_slice %54 {offsets = [0, 128], sizes = [8, 128], strides = [1, 1]} : vector<8x256xf32> to vector<8x128xf32>
    %57 = arith.negf %55 : vector<8x128xf32>
    %58 = math.exp %57 : vector<8x128xf32>
    %cst_14 = arith.constant 1.000000e+00 : f32
    %59 = vector.broadcast %cst_14 : f32 to vector<8x128xf32>
    %60 = arith.addf %59, %58 : vector<8x128xf32>
    %61 = arith.divf %59, %60 : vector<8x128xf32>
    %62 = math.tanh %56 : vector<8x128xf32>
    %63 = arith.negf %56 : vector<8x128xf32>
    %64 = math.exp %63 : vector<8x128xf32>
    %cst_15 = arith.constant 1.000000e+00 : f32
    %65 = vector.broadcast %cst_15 : f32 to vector<8x128xf32>
    %66 = arith.addf %65, %64 : vector<8x128xf32>
    %67 = arith.divf %65, %66 : vector<8x128xf32>
    %68 = vector.extract_strided_slice %61 {offsets = [0, 0], sizes = [8, 64], strides = [1, 1]} : vector<8x128xf32> to vector<8x64xf32>
    %69 = vector.extract_strided_slice %61 {offsets = [0, 64], sizes = [8, 64], strides = [1, 1]} : vector<8x128xf32> to vector<8x64xf32>
    %70 = vector.extract_strided_slice %62 {offsets = [0, 0], sizes = [8, 64], strides = [1, 1]} : vector<8x128xf32> to vector<8x64xf32>
    %71 = vector.extract_strided_slice %67 {offsets = [0, 64], sizes = [8, 64], strides = [1, 1]} : vector<8x128xf32> to vector<8x64xf32>
    %72 = arith.mulf %69, %39 : vector<8x64xf32>
    %73 = arith.mulf %68, %70 : vector<8x64xf32>
    %74 = arith.addf %72, %73 : vector<8x64xf32>
    %75 = math.tanh %74 : vector<8x64xf32>
    %76 = arith.mulf %71, %75 : vector<8x64xf32>
    %77 = vector.extract_strided_slice %0 {offsets = [0, 2], sizes = [8, 1], strides = [1, 1]} : vector<8x8xf32> to vector<8x1xf32>
    %78 = vector.broadcast %77 : vector<8x1xf32> to vector<8x256xf32>
    %79 = vector.broadcast %1 : vector<1x256xf32> to vector<8x256xf32>
    %80 = arith.mulf %78, %79 : vector<8x256xf32>
    %81 = vector.extract_strided_slice %0 {offsets = [0, 5], sizes = [8, 1], strides = [1, 1]} : vector<8x8xf32> to vector<8x1xf32>
    %82 = vector.broadcast %81 : vector<8x1xf32> to vector<8x256xf32>
    %83 = vector.broadcast %2 : vector<1x256xf32> to vector<8x256xf32>
    %84 = arith.mulf %82, %83 : vector<8x256xf32>
    %85 = arith.addf %80, %84 : vector<8x256xf32>
    %86 = vector.broadcast %3 : vector<1x256xf32> to vector<8x256xf32>
    %87 = arith.addf %85, %86 : vector<8x256xf32>
    %cst_16 = arith.constant dense<0.000000e+00> : vector<8x256xf32>
    %88 = tpu.matmul %76, %4, %cst_16 {dimension_numbers = #tpu.dot_dimension_numbers<[1], [0], [0], [1], [0, 0, 1, 1], [], []>} : vector<8x64xf32>, vector<64x256xf32>, vector<8x256xf32> -> vector<8x256xf32>
    %89 = arith.addf %87, %88 : vector<8x256xf32>
    %90 = vector.extract_strided_slice %89 {offsets = [0, 0], sizes = [8, 128], strides = [1, 1]} : vector<8x256xf32> to vector<8x128xf32>
    %91 = vector.extract_strided_slice %89 {offsets = [0, 128], sizes = [8, 128], strides = [1, 1]} : vector<8x256xf32> to vector<8x128xf32>
    %92 = arith.negf %90 : vector<8x128xf32>
    %93 = math.exp %92 : vector<8x128xf32>
    %cst_17 = arith.constant 1.000000e+00 : f32
    %94 = vector.broadcast %cst_17 : f32 to vector<8x128xf32>
    %95 = arith.addf %94, %93 : vector<8x128xf32>
    %96 = arith.divf %94, %95 : vector<8x128xf32>
    %97 = math.tanh %91 : vector<8x128xf32>
    %98 = arith.negf %91 : vector<8x128xf32>
    %99 = math.exp %98 : vector<8x128xf32>
    %cst_18 = arith.constant 1.000000e+00 : f32
    %100 = vector.broadcast %cst_18 : f32 to vector<8x128xf32>
    %101 = arith.addf %100, %99 : vector<8x128xf32>
    %102 = arith.divf %100, %101 : vector<8x128xf32>
    %103 = vector.extract_strided_slice %96 {offsets = [0, 0], sizes = [8, 64], strides = [1, 1]} : vector<8x128xf32> to vector<8x64xf32>
    %104 = vector.extract_strided_slice %96 {offsets = [0, 64], sizes = [8, 64], strides = [1, 1]} : vector<8x128xf32> to vector<8x64xf32>
    %105 = vector.extract_strided_slice %97 {offsets = [0, 0], sizes = [8, 64], strides = [1, 1]} : vector<8x128xf32> to vector<8x64xf32>
    %106 = vector.extract_strided_slice %102 {offsets = [0, 64], sizes = [8, 64], strides = [1, 1]} : vector<8x128xf32> to vector<8x64xf32>
    %107 = arith.mulf %104, %74 : vector<8x64xf32>
    %108 = arith.mulf %103, %105 : vector<8x64xf32>
    %109 = arith.addf %107, %108 : vector<8x64xf32>
    %110 = math.tanh %109 : vector<8x64xf32>
    %111 = arith.mulf %106, %110 : vector<8x64xf32>
    %112 = vector.extract_strided_slice %0 {offsets = [0, 3], sizes = [8, 1], strides = [1, 1]} : vector<8x8xf32> to vector<8x1xf32>
    %113 = vector.broadcast %112 : vector<8x1xf32> to vector<8x256xf32>
    %114 = vector.broadcast %1 : vector<1x256xf32> to vector<8x256xf32>
    %115 = arith.mulf %113, %114 : vector<8x256xf32>
    %116 = vector.extract_strided_slice %0 {offsets = [0, 4], sizes = [8, 1], strides = [1, 1]} : vector<8x8xf32> to vector<8x1xf32>
    %117 = vector.broadcast %116 : vector<8x1xf32> to vector<8x256xf32>
    %118 = vector.broadcast %2 : vector<1x256xf32> to vector<8x256xf32>
    %119 = arith.mulf %117, %118 : vector<8x256xf32>
    %120 = arith.addf %115, %119 : vector<8x256xf32>
    %121 = vector.broadcast %3 : vector<1x256xf32> to vector<8x256xf32>
    %122 = arith.addf %120, %121 : vector<8x256xf32>
    %cst_19 = arith.constant dense<0.000000e+00> : vector<8x256xf32>
    %123 = tpu.matmul %111, %4, %cst_19 {dimension_numbers = #tpu.dot_dimension_numbers<[1], [0], [0], [1], [0, 0, 1, 1], [], []>} : vector<8x64xf32>, vector<64x256xf32>, vector<8x256xf32> -> vector<8x256xf32>
    %124 = arith.addf %122, %123 : vector<8x256xf32>
    %125 = vector.extract_strided_slice %124 {offsets = [0, 0], sizes = [8, 128], strides = [1, 1]} : vector<8x256xf32> to vector<8x128xf32>
    %126 = vector.extract_strided_slice %124 {offsets = [0, 128], sizes = [8, 128], strides = [1, 1]} : vector<8x256xf32> to vector<8x128xf32>
    %127 = arith.negf %125 : vector<8x128xf32>
    %128 = math.exp %127 : vector<8x128xf32>
    %cst_20 = arith.constant 1.000000e+00 : f32
    %129 = vector.broadcast %cst_20 : f32 to vector<8x128xf32>
    %130 = arith.addf %129, %128 : vector<8x128xf32>
    %131 = arith.divf %129, %130 : vector<8x128xf32>
    %132 = math.tanh %126 : vector<8x128xf32>
    %133 = arith.negf %126 : vector<8x128xf32>
    %134 = math.exp %133 : vector<8x128xf32>
    %cst_21 = arith.constant 1.000000e+00 : f32
    %135 = vector.broadcast %cst_21 : f32 to vector<8x128xf32>
    %136 = arith.addf %135, %134 : vector<8x128xf32>
    %137 = arith.divf %135, %136 : vector<8x128xf32>
    %138 = vector.extract_strided_slice %131 {offsets = [0, 0], sizes = [8, 64], strides = [1, 1]} : vector<8x128xf32> to vector<8x64xf32>
    %139 = vector.extract_strided_slice %131 {offsets = [0, 64], sizes = [8, 64], strides = [1, 1]} : vector<8x128xf32> to vector<8x64xf32>
    %140 = vector.extract_strided_slice %132 {offsets = [0, 0], sizes = [8, 64], strides = [1, 1]} : vector<8x128xf32> to vector<8x64xf32>
    %141 = vector.extract_strided_slice %137 {offsets = [0, 64], sizes = [8, 64], strides = [1, 1]} : vector<8x128xf32> to vector<8x64xf32>
    %142 = arith.mulf %139, %109 : vector<8x64xf32>
    %143 = arith.mulf %138, %140 : vector<8x64xf32>
    %144 = arith.addf %142, %143 : vector<8x64xf32>
    %145 = math.tanh %144 : vector<8x64xf32>
    %146 = arith.mulf %141, %145 : vector<8x64xf32>
    %147 = vector.extract_strided_slice %0 {offsets = [0, 4], sizes = [8, 1], strides = [1, 1]} : vector<8x8xf32> to vector<8x1xf32>
    %148 = vector.broadcast %147 : vector<8x1xf32> to vector<8x256xf32>
    %149 = vector.broadcast %1 : vector<1x256xf32> to vector<8x256xf32>
    %150 = arith.mulf %148, %149 : vector<8x256xf32>
    %151 = vector.extract_strided_slice %0 {offsets = [0, 3], sizes = [8, 1], strides = [1, 1]} : vector<8x8xf32> to vector<8x1xf32>
    %152 = vector.broadcast %151 : vector<8x1xf32> to vector<8x256xf32>
    %153 = vector.broadcast %2 : vector<1x256xf32> to vector<8x256xf32>
    %154 = arith.mulf %152, %153 : vector<8x256xf32>
    %155 = arith.addf %150, %154 : vector<8x256xf32>
    %156 = vector.broadcast %3 : vector<1x256xf32> to vector<8x256xf32>
    %157 = arith.addf %155, %156 : vector<8x256xf32>
    %cst_22 = arith.constant dense<0.000000e+00> : vector<8x256xf32>
    %158 = tpu.matmul %146, %4, %cst_22 {dimension_numbers = #tpu.dot_dimension_numbers<[1], [0], [0], [1], [0, 0, 1, 1], [], []>} : vector<8x64xf32>, vector<64x256xf32>, vector<8x256xf32> -> vector<8x256xf32>
    %159 = arith.addf %157, %158 : vector<8x256xf32>
    %160 = vector.extract_strided_slice %159 {offsets = [0, 0], sizes = [8, 128], strides = [1, 1]} : vector<8x256xf32> to vector<8x128xf32>
    %161 = vector.extract_strided_slice %159 {offsets = [0, 128], sizes = [8, 128], strides = [1, 1]} : vector<8x256xf32> to vector<8x128xf32>
    %162 = arith.negf %160 : vector<8x128xf32>
    %163 = math.exp %162 : vector<8x128xf32>
    %cst_23 = arith.constant 1.000000e+00 : f32
    %164 = vector.broadcast %cst_23 : f32 to vector<8x128xf32>
    %165 = arith.addf %164, %163 : vector<8x128xf32>
    %166 = arith.divf %164, %165 : vector<8x128xf32>
    %167 = math.tanh %161 : vector<8x128xf32>
    %168 = arith.negf %161 : vector<8x128xf32>
    %169 = math.exp %168 : vector<8x128xf32>
    %cst_24 = arith.constant 1.000000e+00 : f32
    %170 = vector.broadcast %cst_24 : f32 to vector<8x128xf32>
    %171 = arith.addf %170, %169 : vector<8x128xf32>
    %172 = arith.divf %170, %171 : vector<8x128xf32>
    %173 = vector.extract_strided_slice %166 {offsets = [0, 0], sizes = [8, 64], strides = [1, 1]} : vector<8x128xf32> to vector<8x64xf32>
    %174 = vector.extract_strided_slice %166 {offsets = [0, 64], sizes = [8, 64], strides = [1, 1]} : vector<8x128xf32> to vector<8x64xf32>
    %175 = vector.extract_strided_slice %167 {offsets = [0, 0], sizes = [8, 64], strides = [1, 1]} : vector<8x128xf32> to vector<8x64xf32>
    %176 = vector.extract_strided_slice %172 {offsets = [0, 64], sizes = [8, 64], strides = [1, 1]} : vector<8x128xf32> to vector<8x64xf32>
    %177 = arith.mulf %174, %144 : vector<8x64xf32>
    %178 = arith.mulf %173, %175 : vector<8x64xf32>
    %179 = arith.addf %177, %178 : vector<8x64xf32>
    %180 = math.tanh %179 : vector<8x64xf32>
    %181 = arith.mulf %176, %180 : vector<8x64xf32>
    %182 = vector.extract_strided_slice %0 {offsets = [0, 5], sizes = [8, 1], strides = [1, 1]} : vector<8x8xf32> to vector<8x1xf32>
    %183 = vector.broadcast %182 : vector<8x1xf32> to vector<8x256xf32>
    %184 = vector.broadcast %1 : vector<1x256xf32> to vector<8x256xf32>
    %185 = arith.mulf %183, %184 : vector<8x256xf32>
    %186 = vector.extract_strided_slice %0 {offsets = [0, 2], sizes = [8, 1], strides = [1, 1]} : vector<8x8xf32> to vector<8x1xf32>
    %187 = vector.broadcast %186 : vector<8x1xf32> to vector<8x256xf32>
    %188 = vector.broadcast %2 : vector<1x256xf32> to vector<8x256xf32>
    %189 = arith.mulf %187, %188 : vector<8x256xf32>
    %190 = arith.addf %185, %189 : vector<8x256xf32>
    %191 = vector.broadcast %3 : vector<1x256xf32> to vector<8x256xf32>
    %192 = arith.addf %190, %191 : vector<8x256xf32>
    %cst_25 = arith.constant dense<0.000000e+00> : vector<8x256xf32>
    %193 = tpu.matmul %181, %4, %cst_25 {dimension_numbers = #tpu.dot_dimension_numbers<[1], [0], [0], [1], [0, 0, 1, 1], [], []>} : vector<8x64xf32>, vector<64x256xf32>, vector<8x256xf32> -> vector<8x256xf32>
    %194 = arith.addf %192, %193 : vector<8x256xf32>
    %195 = vector.extract_strided_slice %194 {offsets = [0, 0], sizes = [8, 128], strides = [1, 1]} : vector<8x256xf32> to vector<8x128xf32>
    %196 = vector.extract_strided_slice %194 {offsets = [0, 128], sizes = [8, 128], strides = [1, 1]} : vector<8x256xf32> to vector<8x128xf32>
    %197 = arith.negf %195 : vector<8x128xf32>
    %198 = math.exp %197 : vector<8x128xf32>
    %cst_26 = arith.constant 1.000000e+00 : f32
    %199 = vector.broadcast %cst_26 : f32 to vector<8x128xf32>
    %200 = arith.addf %199, %198 : vector<8x128xf32>
    %201 = arith.divf %199, %200 : vector<8x128xf32>
    %202 = math.tanh %196 : vector<8x128xf32>
    %203 = arith.negf %196 : vector<8x128xf32>
    %204 = math.exp %203 : vector<8x128xf32>
    %cst_27 = arith.constant 1.000000e+00 : f32
    %205 = vector.broadcast %cst_27 : f32 to vector<8x128xf32>
    %206 = arith.addf %205, %204 : vector<8x128xf32>
    %207 = arith.divf %205, %206 : vector<8x128xf32>
    %208 = vector.extract_strided_slice %201 {offsets = [0, 0], sizes = [8, 64], strides = [1, 1]} : vector<8x128xf32> to vector<8x64xf32>
    %209 = vector.extract_strided_slice %201 {offsets = [0, 64], sizes = [8, 64], strides = [1, 1]} : vector<8x128xf32> to vector<8x64xf32>
    %210 = vector.extract_strided_slice %202 {offsets = [0, 0], sizes = [8, 64], strides = [1, 1]} : vector<8x128xf32> to vector<8x64xf32>
    %211 = vector.extract_strided_slice %207 {offsets = [0, 64], sizes = [8, 64], strides = [1, 1]} : vector<8x128xf32> to vector<8x64xf32>
    %212 = arith.mulf %209, %179 : vector<8x64xf32>
    %213 = arith.mulf %208, %210 : vector<8x64xf32>
    %214 = arith.addf %212, %213 : vector<8x64xf32>
    %215 = math.tanh %214 : vector<8x64xf32>
    %216 = arith.mulf %211, %215 : vector<8x64xf32>
    %217 = vector.extract_strided_slice %0 {offsets = [0, 6], sizes = [8, 1], strides = [1, 1]} : vector<8x8xf32> to vector<8x1xf32>
    %218 = vector.broadcast %217 : vector<8x1xf32> to vector<8x256xf32>
    %219 = vector.broadcast %1 : vector<1x256xf32> to vector<8x256xf32>
    %220 = arith.mulf %218, %219 : vector<8x256xf32>
    %221 = vector.extract_strided_slice %0 {offsets = [0, 1], sizes = [8, 1], strides = [1, 1]} : vector<8x8xf32> to vector<8x1xf32>
    %222 = vector.broadcast %221 : vector<8x1xf32> to vector<8x256xf32>
    %223 = vector.broadcast %2 : vector<1x256xf32> to vector<8x256xf32>
    %224 = arith.mulf %222, %223 : vector<8x256xf32>
    %225 = arith.addf %220, %224 : vector<8x256xf32>
    %226 = vector.broadcast %3 : vector<1x256xf32> to vector<8x256xf32>
    %227 = arith.addf %225, %226 : vector<8x256xf32>
    %cst_28 = arith.constant dense<0.000000e+00> : vector<8x256xf32>
    %228 = tpu.matmul %216, %4, %cst_28 {dimension_numbers = #tpu.dot_dimension_numbers<[1], [0], [0], [1], [0, 0, 1, 1], [], []>} : vector<8x64xf32>, vector<64x256xf32>, vector<8x256xf32> -> vector<8x256xf32>
    %229 = arith.addf %227, %228 : vector<8x256xf32>
    %230 = vector.extract_strided_slice %229 {offsets = [0, 0], sizes = [8, 128], strides = [1, 1]} : vector<8x256xf32> to vector<8x128xf32>
    %231 = vector.extract_strided_slice %229 {offsets = [0, 128], sizes = [8, 128], strides = [1, 1]} : vector<8x256xf32> to vector<8x128xf32>
    %232 = arith.negf %230 : vector<8x128xf32>
    %233 = math.exp %232 : vector<8x128xf32>
    %cst_29 = arith.constant 1.000000e+00 : f32
    %234 = vector.broadcast %cst_29 : f32 to vector<8x128xf32>
    %235 = arith.addf %234, %233 : vector<8x128xf32>
    %236 = arith.divf %234, %235 : vector<8x128xf32>
    %237 = math.tanh %231 : vector<8x128xf32>
    %238 = arith.negf %231 : vector<8x128xf32>
    %239 = math.exp %238 : vector<8x128xf32>
    %cst_30 = arith.constant 1.000000e+00 : f32
    %240 = vector.broadcast %cst_30 : f32 to vector<8x128xf32>
    %241 = arith.addf %240, %239 : vector<8x128xf32>
    %242 = arith.divf %240, %241 : vector<8x128xf32>
    %243 = vector.extract_strided_slice %236 {offsets = [0, 0], sizes = [8, 64], strides = [1, 1]} : vector<8x128xf32> to vector<8x64xf32>
    %244 = vector.extract_strided_slice %236 {offsets = [0, 64], sizes = [8, 64], strides = [1, 1]} : vector<8x128xf32> to vector<8x64xf32>
    %245 = vector.extract_strided_slice %237 {offsets = [0, 0], sizes = [8, 64], strides = [1, 1]} : vector<8x128xf32> to vector<8x64xf32>
    %246 = vector.extract_strided_slice %242 {offsets = [0, 64], sizes = [8, 64], strides = [1, 1]} : vector<8x128xf32> to vector<8x64xf32>
    %247 = arith.mulf %244, %214 : vector<8x64xf32>
    %248 = arith.mulf %243, %245 : vector<8x64xf32>
    %249 = arith.addf %247, %248 : vector<8x64xf32>
    %250 = math.tanh %249 : vector<8x64xf32>
    %251 = arith.mulf %246, %250 : vector<8x64xf32>
    %252 = vector.extract_strided_slice %0 {offsets = [0, 7], sizes = [8, 1], strides = [1, 1]} : vector<8x8xf32> to vector<8x1xf32>
    %253 = vector.broadcast %252 : vector<8x1xf32> to vector<8x256xf32>
    %254 = vector.broadcast %1 : vector<1x256xf32> to vector<8x256xf32>
    %255 = arith.mulf %253, %254 : vector<8x256xf32>
    %256 = vector.extract_strided_slice %0 {offsets = [0, 0], sizes = [8, 1], strides = [1, 1]} : vector<8x8xf32> to vector<8x1xf32>
    %257 = vector.broadcast %256 : vector<8x1xf32> to vector<8x256xf32>
    %258 = vector.broadcast %2 : vector<1x256xf32> to vector<8x256xf32>
    %259 = arith.mulf %257, %258 : vector<8x256xf32>
    %260 = arith.addf %255, %259 : vector<8x256xf32>
    %261 = vector.broadcast %3 : vector<1x256xf32> to vector<8x256xf32>
    %262 = arith.addf %260, %261 : vector<8x256xf32>
    %cst_31 = arith.constant dense<0.000000e+00> : vector<8x256xf32>
    %263 = tpu.matmul %251, %4, %cst_31 {dimension_numbers = #tpu.dot_dimension_numbers<[1], [0], [0], [1], [0, 0, 1, 1], [], []>} : vector<8x64xf32>, vector<64x256xf32>, vector<8x256xf32> -> vector<8x256xf32>
    %264 = arith.addf %262, %263 : vector<8x256xf32>
    %265 = vector.extract_strided_slice %264 {offsets = [0, 0], sizes = [8, 128], strides = [1, 1]} : vector<8x256xf32> to vector<8x128xf32>
    %266 = vector.extract_strided_slice %264 {offsets = [0, 128], sizes = [8, 128], strides = [1, 1]} : vector<8x256xf32> to vector<8x128xf32>
    %267 = arith.negf %265 : vector<8x128xf32>
    %268 = math.exp %267 : vector<8x128xf32>
    %cst_32 = arith.constant 1.000000e+00 : f32
    %269 = vector.broadcast %cst_32 : f32 to vector<8x128xf32>
    %270 = arith.addf %269, %268 : vector<8x128xf32>
    %271 = arith.divf %269, %270 : vector<8x128xf32>
    %272 = math.tanh %266 : vector<8x128xf32>
    %273 = arith.negf %266 : vector<8x128xf32>
    %274 = math.exp %273 : vector<8x128xf32>
    %cst_33 = arith.constant 1.000000e+00 : f32
    %275 = vector.broadcast %cst_33 : f32 to vector<8x128xf32>
    %276 = arith.addf %275, %274 : vector<8x128xf32>
    %277 = arith.divf %275, %276 : vector<8x128xf32>
    %278 = vector.extract_strided_slice %271 {offsets = [0, 0], sizes = [8, 64], strides = [1, 1]} : vector<8x128xf32> to vector<8x64xf32>
    %279 = vector.extract_strided_slice %271 {offsets = [0, 64], sizes = [8, 64], strides = [1, 1]} : vector<8x128xf32> to vector<8x64xf32>
    %280 = vector.extract_strided_slice %272 {offsets = [0, 0], sizes = [8, 64], strides = [1, 1]} : vector<8x128xf32> to vector<8x64xf32>
    %281 = vector.extract_strided_slice %277 {offsets = [0, 64], sizes = [8, 64], strides = [1, 1]} : vector<8x128xf32> to vector<8x64xf32>
    %282 = arith.mulf %279, %249 : vector<8x64xf32>
    %283 = arith.mulf %278, %280 : vector<8x64xf32>
    %284 = arith.addf %282, %283 : vector<8x64xf32>
    %285 = math.tanh %284 : vector<8x64xf32>
    %286 = arith.mulf %281, %285 : vector<8x64xf32>
    %287 = tpu.iota {dimensions = array<i32: 1>} : vector<8x64xi32>
    %c32_i32 = arith.constant 32 : i32
    %288 = vector.broadcast %c32_i32 : i32 to vector<8x64xi32>
    %289 = arith.cmpi slt, %287, %288 : vector<8x64xi32>
    %290 = arith.select %289, %41, %286 : vector<8x64xi1>, vector<8x64xf32>
    %291 = arith.select %289, %76, %251 : vector<8x64xi1>, vector<8x64xf32>
    %292 = arith.select %289, %111, %216 : vector<8x64xi1>, vector<8x64xf32>
    %293 = arith.select %289, %146, %181 : vector<8x64xi1>, vector<8x64xf32>
    %294 = arith.select %289, %181, %146 : vector<8x64xi1>, vector<8x64xf32>
    %295 = arith.select %289, %216, %111 : vector<8x64xi1>, vector<8x64xf32>
    %296 = arith.select %289, %251, %76 : vector<8x64xi1>, vector<8x64xf32>
    %297 = arith.select %289, %286, %41 : vector<8x64xi1>, vector<8x64xf32>
    %298 = tpu.concatenate %290, %291, %292, %293, %294, %295, %296, %297 in 0 : vector<8x64xf32>, vector<8x64xf32>, vector<8x64xf32>, vector<8x64xf32>, vector<8x64xf32>, vector<8x64xf32>, vector<8x64xf32>, vector<8x64xf32> -> vector<64x64xf32>
    %c0_34 = arith.constant 0 : index
    %c0_35 = arith.constant 0 : index
    %299 = vector.load %arg6[%c0_34, %c0_35] : memref<64x128xf32, #tpu.memory_space<vmem>>, vector<64x128xf32>
    %cst_36 = arith.constant dense<0.000000e+00> : vector<64x128xf32>
    %300 = tpu.matmul %298, %299, %cst_36 {dimension_numbers = #tpu.dot_dimension_numbers<[1], [0], [0], [1], [0, 0, 1, 1], [], []>} : vector<64x64xf32>, vector<64x128xf32>, vector<64x128xf32> -> vector<64x128xf32>
    %c0_37 = arith.constant 0 : index
    %c0_38 = arith.constant 0 : index
    %301 = vector.load %arg7[%c0_37, %c0_38] : memref<1x128xf32, #tpu.memory_space<vmem>>, vector<1x128xf32>
    %302 = vector.broadcast %301 : vector<1x128xf32> to vector<64x128xf32>
    %303 = arith.addf %300, %302 : vector<64x128xf32>
    %cst_39 = arith.constant 0.000000e+00 : f32
    %304 = vector.broadcast %cst_39 : f32 to vector<64x128xf32>
    %305 = arith.maximumf %303, %304 : vector<64x128xf32>
    %c0_40 = arith.constant 0 : index
    %c0_41 = arith.constant 0 : index
    %306 = vector.load %arg8[%c0_40, %c0_41] : memref<128x3xf32, #tpu.memory_space<vmem>>, vector<128x3xf32>
    %cst_42 = arith.constant dense<0.000000e+00> : vector<64x3xf32>
    %307 = tpu.matmul %305, %306, %cst_42 {dimension_numbers = #tpu.dot_dimension_numbers<[1], [0], [0], [1], [0, 0, 1, 1], [], []>} : vector<64x128xf32>, vector<128x3xf32>, vector<64x3xf32> -> vector<64x3xf32>
    %c0_43 = arith.constant 0 : index
    %c0_44 = arith.constant 0 : index
    %308 = vector.load %arg9[%c0_43, %c0_44] : memref<1x3xf32, #tpu.memory_space<vmem>>, vector<1x3xf32>
    %309 = vector.broadcast %308 : vector<1x3xf32> to vector<64x3xf32>
    %310 = arith.addf %307, %309 : vector<64x3xf32>
    %cst_45 = arith.constant dense<0xFF800000> : vector<64xf32>
    %311 = vector.multi_reduction <maximumf>, %310, %cst_45 [1] : vector<64x3xf32> to vector<64xf32>
    %312 = vector.shape_cast %311 : vector<64xf32> to vector<64x1xf32>
    %313 = vector.broadcast %312 : vector<64x1xf32> to vector<64x3xf32>
    %314 = arith.subf %310, %313 : vector<64x3xf32>
    %315 = math.exp %314 : vector<64x3xf32>
    %cst_46 = arith.constant dense<0.000000e+00> : vector<64xf32>
    %316 = vector.multi_reduction <add>, %315, %cst_46 [1] : vector<64x3xf32> to vector<64xf32>
    %317 = vector.shape_cast %316 : vector<64xf32> to vector<64x1xf32>
    %318 = tpu.reciprocal %317 {approx = true} : vector<64x1xf32> -> vector<64x1xf32>
    %319 = vector.broadcast %318 : vector<64x1xf32> to vector<64x3xf32>
    %320 = arith.mulf %315, %319 : vector<64x3xf32>
    %321 = vector.shape_cast %320 : vector<64x3xf32> to vector<8x8x3xf32>
    %cst_47 = arith.constant dense<0.000000e+00> : vector<8x3xf32>
    %322 = vector.multi_reduction <add>, %321, %cst_47 [0] : vector<8x8x3xf32> to vector<8x3xf32>
    %cst_48 = arith.constant 1.250000e-01 : f32
    %323 = vector.broadcast %cst_48 : f32 to vector<8x3xf32>
    %324 = arith.mulf %322, %323 : vector<8x3xf32>
    %c0_49 = arith.constant 0 : index
    %c0_50 = arith.constant 0 : index
    %325 = vector.load %arg10[%c0_49, %c0_50] : memref<8x3xf32, #tpu.memory_space<vmem>>, vector<8x3xf32>
    tpu.vector_store %arg10[%c0_49, %c0_50], %324 {strides = array<i32>} : memref<8x3xf32, #tpu.memory_space<vmem>>, vector<8x3xf32>,
    return
  }
  func.func @transform_0(%arg0: i32) -> (i32, i32) {
    %c0_i32 = arith.constant 0 : i32
    %c0_i32_0 = arith.constant 0 : i32
    return %arg0, %c0_i32 : i32, i32
  }
  func.func @transform_1(%arg0: i32) -> (i32, i32) {
    %c0_i32 = arith.constant 0 : i32
    %c0_i32_0 = arith.constant 0 : i32
    %c0_i32_1 = arith.constant 0 : i32
    return %c0_i32, %c0_i32_0 : i32, i32
  }
  func.func @transform_2(%arg0: i32) -> (i32, i32) {
    %c0_i32 = arith.constant 0 : i32
    %c0_i32_0 = arith.constant 0 : i32
    %c0_i32_1 = arith.constant 0 : i32
    return %c0_i32, %c0_i32_0 : i32, i32
  }
  func.func @transform_3(%arg0: i32) -> (i32, i32) {
    %c0_i32 = arith.constant 0 : i32
    %c0_i32_0 = arith.constant 0 : i32
    %c0_i32_1 = arith.constant 0 : i32
    return %c0_i32, %c0_i32_0 : i32, i32
  }
  func.func @transform_4(%arg0: i32) -> (i32, i32) {
    %c0_i32 = arith.constant 0 : i32
    %c0_i32_0 = arith.constant 0 : i32
    %c0_i32_1 = arith.constant 0 : i32
    return %c0_i32, %c0_i32_0 : i32, i32
  }
  func.func @transform_5(%arg0: i32) -> (i32, i32) {
    %c0_i32 = arith.constant 0 : i32
    %c0_i32_0 = arith.constant 0 : i32
    %c0_i32_1 = arith.constant 0 : i32
    return %c0_i32, %c0_i32_0 : i32, i32
  }
  func.func @transform_6(%arg0: i32) -> (i32, i32) {
    %c0_i32 = arith.constant 0 : i32
    %c0_i32_0 = arith.constant 0 : i32
    %c0_i32_1 = arith.constant 0 : i32
    return %c0_i32, %c0_i32_0 : i32, i32
  }
  func.func @transform_7(%arg0: i32) -> (i32, i32) {
    %c0_i32 = arith.constant 0 : i32
    %c0_i32_0 = arith.constant 0 : i32
    %c0_i32_1 = arith.constant 0 : i32
    return %c0_i32, %c0_i32_0 : i32, i32
  }
  func.func @transform_8(%arg0: i32) -> (i32, i32) {
    %c0_i32 = arith.constant 0 : i32
    %c0_i32_0 = arith.constant 0 : i32
    %c0_i32_1 = arith.constant 0 : i32
    return %c0_i32, %c0_i32_0 : i32, i32
  }
  func.func @transform_9(%arg0: i32) -> (i32, i32) {
    %c0_i32 = arith.constant 0 : i32
    %c0_i32_0 = arith.constant 0 : i32
    return %arg0, %c0_i32 : i32, i32
  }
}

</mosaic_0001>

<bundles_post_ra>
// kernel: tpu_custom_call.1
= control target key start
LH: loop header
LB: loop body
LE: loop exit
PB: predicated region body
PF: predicated region fallthrough
CT: control target
= control target key end

     0   :  { %14 = vsyncpa [#allocation3], 0  ;;  %s2402_s0 = inlined_call_operand.vmem [shape: f32[8,8], index: 0, kind: input, shape index: {}]   ;;  %s2403_s1 = inlined_call_operand.hbm [shape: f32[1,256], index: 1, kind: input, shape index: {}]   ;;  %s2404_s2 = inlined_call_operand.hbm [shape: f32[1,256], index: 2, kind: input, shape index: {}]   ;;  %s2405_s3 = inlined_call_operand.hbm [shape: f32[1,256], index: 3, kind: input, shape index: {}]   ;;  %s2406_s4 = inlined_call_operand.vmem [shape: f32[64,256], index: 4, kind: input, shape index: {}]   ;;  %s2407_s5 = inlined_call_operand.hbm [shape: f32[64,128], index: 5, kind: input, shape index: {}]   ;;  %s2408_s6 = inlined_call_operand.vmem [shape: f32[1,128], index: 6, kind: input, shape index: {}]   ;;  %s2409_s7 = inlined_call_operand.vmem [shape: f32[128,3], index: 7, kind: input, shape index: {}]   ;;  %s2410_s8 = inlined_call_operand.vmem [shape: f32[1,3], index: 8, kind: input, shape index: {}]   ;;  %s2411_s9 = inlined_call_operand.vmem [shape: f32[8,3], index: 9, kind: output, shape index: {}]  }
   0x1   :  { %15 = vsyncpa [#allocation5], 0 }
   0x2   :  { %16 = vsyncpa [#allocation8], 0  ;;  %s1828_s30 = smov [#allocation4]   ;;  %s1829_s11 = smov [#allocation2]  }
   0x3   :  { %s35_s10 = sshll.u32 %s1828_s30, 4  ;;  %s25_s12 = sshll.u32 %s1829_s11, 4  ;;  %s36_s10 = int_to_ptr.vmem [resolvable:$true] %s35_s10  ;;  %s26_s12 = int_to_ptr.vmem [resolvable:$true] %s25_s12 }
   0x4   :  { %s1750_s13 = scalar_lea.vmem %s36_s10, 32  ;;  %p1755_p1 = scmp.lt.s32.totalorder %s36_s10, %s36_s10 }
   0x5   :  { %p1751_p0 = scmp.ne.s32.totalorder %s36_s10, %s1750_s13  ;;  %p1756_p2 = scmp.lt.s32.totalorder %s1750_s13, %s1750_s13 }
   0x7   :  { %p1757_p3 = por %p1756_p2, %p1755_p1 }
   0x9   :  { %p1758_p4 = pnand %p1757_p3, %p1751_p0 }
   0xb   :  { %1761 = shalt.err (!%p1758_p4)
}
   0xc   :  { %38 = dma.hbm_to_vmem [thread:$0]  %s2404_s2, 32, %s36_s10, [#allocation5]  }
   0xd   :  { %s1770_s16 = scalar_lea.vmem %s26_s12, 32  ;;  %p1775_p6 = scmp.lt.s32.totalorder %s26_s12, %s26_s12 }
   0xe   :  { %p1771_p5 = scmp.ne.s32.totalorder %s26_s12, %s1770_s16  ;;  %p1776_p7 = scmp.lt.s32.totalorder %s1770_s16, %s1770_s16 }
  0x10   :  { %p1777_p8 = por %p1776_p7, %p1775_p6 }
  0x12   :  { %p1778_p9 = pnand %p1777_p8, %p1771_p5 }
  0x14   :  { %1781 = shalt.err (!%p1778_p9)
}
  0x15   :  { %28 = dma.hbm_to_vmem [thread:$0]  %s2403_s1, 32, %s26_s12, [#allocation3]  }
  0x16   :  { %s1830_s19 = smov [#allocation6]   ;;  %s1831_s21 = smov [#allocation7]  }
  0x17   :  { %s45_s20 = sshll.u32 %s1830_s19, 4  ;;  %s56_s22 = sshll.u32 %s1831_s21, 4  ;;  %s46_s20 = int_to_ptr.vmem [resolvable:$true] %s45_s20  ;;  %s57_s22 = int_to_ptr.vmem [resolvable:$true] %s56_s22 }
  0x18   :  { %s1790_s23 = scalar_lea.vmem %s46_s20, 32  ;;  %p1795_p11 = scmp.lt.s32.totalorder %s46_s20, %s46_s20 }
  0x19   :  { %p1791_p10 = scmp.ne.s32.totalorder %s46_s20, %s1790_s23  ;;  %p1796_p12 = scmp.lt.s32.totalorder %s1790_s23, %s1790_s23 }
  0x1b   :  { %p1797_p13 = por %p1796_p12, %p1795_p11 }
  0x1d   :  { %p1798_p0 = pnand %p1797_p13, %p1791_p10 }
  0x1f   :  { %1801 = shalt.err (!%p1798_p0)
}
  0x20   :  { %48 = dma.hbm_to_vmem [thread:$0]  %s2405_s3, 32, %s46_s20, [#allocation5]  }
  0x21   :  { %s1810_s25 = scalar_lea.vmem %s57_s22, 1024  ;;  %p1815_p2 = scmp.lt.s32.totalorder %s57_s22, %s57_s22 }
  0x22   :  { %p1811_p1 = scmp.ne.s32.totalorder %s57_s22, %s1810_s25  ;;  %p1816_p3 = scmp.lt.s32.totalorder %s1810_s25, %s1810_s25 }
  0x24   :  { %p1817_p4 = por %p1816_p3, %p1815_p2 }
  0x26   :  { %p1818_p5 = pnand %p1817_p4, %p1811_p1 }
  0x28   :  { %1821 = shalt.err (!%p1818_p5)
}
  0x29   :  { %s1832_s1 = smov 128   ;;  %s1833_s26 = smov 8  }
  0x2a   :  { %62 = dma.hbm_to_vmem [thread:$0]  %s2407_s5, 1024, %s57_s22, [#allocation8], %s1832_s1, %s1832_s1, %s1833_s26  }
  0x2b   :  { %1822 = dma.done.wait [#allocation3], 32  }
  0x2c   :  { %1823 = vsyncadd [#allocation3], 4294967264 }
  0x2d   :  { %1824 = dma.done.wait [#allocation5], 64  }
  0x2e   :  { %1825 = vsyncadd [#allocation5], 4294967232 }
  0x2f   :  { %1826 = dma.done.wait [#allocation8], 1024  }
  0x30   :  { %1827 = vsyncadd [#allocation8], 4294966272  ;;  %v1834_v0 = vmov 0.0   ;;  %v1835_v1 = vmov 0   ;;  %v1911_v2 = vld [vmem:[%s2406_s4 + $0x78] sm:$0xff]  ;;  %v1916_v3 = vld [vmem:[%s2406_s4 + $0x70] sm:$0xff]  ;;  %v107_v20 = vlaneseq }
  0x31   :  { %219 = vmatprep.mubr.f32.mxu0 %v1834_v0  ;;  %1606 = vset.pattern.permute.xlu0 %v1835_v1  ;;  %v1921_v4 = vld [vmem:[%s2406_s4 + $0x68] sm:$0xff]  ;;  %v1927_v5 = vld [vmem:[%s2406_s4 + $0x60] sm:$0xff]  ;;  %v1934_v6 = vld [vmem:[%s2406_s4 + $0x58] sm:$0xff]  ;;  %v1836_v16 = vmov 7   ;;  %v1838_v59 = vmov 1   ;;  %v1839_v60 = vmov 6  }
  0x32   :  { %335 = vmatprep.mubr.f32.mxu1 %v1834_v0  ;;  %171 = vmatprep.subr.mxu0 %v1911_v2  ;;  %v1941_v7 = vld [vmem:[%s2406_s4 + $0x50] sm:$0xff]  ;;  %v1948_v8 = vld [vmem:[%s2406_s4 + $0x48] sm:$0xff]  ;;  %v1955_v9 = vld [vmem:[%s2406_s4 + $0x40] sm:$0xff]  ;;  %v108_v21 = vshrl.u32 %v107_v20, 7  ;;  %vm151_vm0 = vcmask 523264   ;;  %vm1332_vm2 = vcmask 23552  }
  0x33   :  { %287 = vmatprep.subr.mxu1 %v1911_v2  ;;  %172 = vmatpush1.msra.mxu0 %v1916_v3  ;;  %v1960_v10 = vld [vmem:[%s2402_s0] sm:$0xff]  ;;  %v1967_v11 = vld [vmem:[%s2406_s4 + $0x38] sm:$0xff]  ;;  %v1974_v12 = vld [vmem:[%s2406_s4 + $0x30] sm:$0xff] }
  0x34   :  { %288 = vmatpush1.msra.mxu1 %v1916_v3  ;;  %173 = vmatprep.subr.mxu0 %v1921_v4  ;;  %v1981_v13 = vld [vmem:[%s2406_s4 + $0x28] sm:$0xff]  ;;  %v1988_v14 = vld [vmem:[%s2406_s4 + $0x20] sm:$0xff]  ;;  %v1995_v15 = vld [vmem:[%s2406_s4 + $0x18] sm:$0xff]  ;;  %v109_v23 = vsub.s32 0, %v108_v21  ;;  %v113_v34 = vsub.s32 1, %v108_v21 }
  0x35   :  { %289 = vmatprep.subr.mxu1 %v1921_v4  ;;  %174 = vmatpush1.msra.mxu0 %v1927_v5  ;;  %v2001_v17 = vld [vmem:[%s2406_s4 + $0x10] sm:$0xff]  ;;  %v2008_v18 = vld [vmem:[%s2406_s4 + $0x8] sm:$0xff]  ;;  %v2015_v19 = vld [vmem:[%s2406_s4] sm:$0xff]  ;;  %s1837_s4 = smov 64  }
  0x36   :  { %290 = vmatpush1.msra.mxu1 %v1927_v5  ;;  %175 = vmatprep.subr.mxu0 %v1934_v6  ;;  %v82_v24 = vld [vmem:[#allocation2] sm:$0x3]  ;;  %v83_v25 = vld [vmem:[#allocation4] sm:$0x3]  ;;  %v84_v31 = vld [vmem:[#allocation6] sm:$0x3] }
  0x37   :  { %291 = vmatprep.subr.mxu1 %v1934_v6  ;;  %176 = vmatpush1.msra.mxu0 %v1941_v7  ;;  %v2050_v26 = vrot.slane %v82_v24, %v109_v23  ;;  %v2052_v27 = vrot.slane %v83_v25, %v109_v23  ;;  %v2060_v33 = vrot.slane %v84_v31, %v109_v23 }
  0x38   :  { %103 = vperm.xlu0 %1606, %v1960_v10   ;;  %177 = vmatprep.subr.mxu0 %v1948_v8  ;;  %v2063_v38 = vrot.slane %v82_v24, %v113_v34  ;;  %v2065_v39 = vrot.slane %v83_v25, %v113_v34  ;;  %v2071_v44 = vrot.slane %v84_v31, %v113_v34 }
  0x39   :  { %292 = vmatpush1.msra.mxu1 %v1941_v7  ;;  %178 = vmatpush1.msra.mxu0 %v1955_v9 }
  0x3a   :  { %293 = vmatprep.subr.mxu1 %v1948_v8  ;;  %179 = vmatprep.subr.mxu0 %v1967_v11 }
  0x3b   :  { %294 = vmatpush1.msra.mxu1 %v1955_v9  ;;  %180 = vmatpush1.msra.mxu0 %v1974_v12 }
  0x3c   :  { %1607 = vset.pattern.permute.xlu0 %v1836_v16  ;;  %181 = vmatprep.subr.mxu0 %v1981_v13 }
  0x3d   :  { %120 = vperm.xlu0 %1607, %v1960_v10   ;;  %182 = vmatpush1.msra.mxu0 %v1988_v14 }
  0x3e   :  { %295 = vmatprep.subr.mxu1 %v1967_v11  ;;  %183 = vmatprep.subr.mxu0 %v1995_v15 }
  0x3f   :  { %296 = vmatpush1.msra.mxu1 %v1974_v12  ;;  %184 = vmatpush1.msra.mxu0 %v2001_v17 }
  0x40   :  { %297 = vmatprep.subr.mxu1 %v1981_v13  ;;  %185 = vmatprep.subr.mxu0 %v2008_v18 }
  0x41   :  { %298 = vmatpush1.msra.mxu1 %v1988_v14  ;;  %186 = vmatpush1.msra.mxu0 %v2015_v19 }
  0x42   :  { %299 = vmatprep.subr.mxu1 %v1995_v15  ;;  %220 = vmatmul.mubr.f32.vlgmr.msra.gmra.mxu0 %v1834_v0 }
  0x43   :  { %300 = vmatpush1.msra.mxu1 %v2001_v17  ;;  %403 = vmatprep.subr.mxu0 %v1911_v2 }
  0x44   :  { %301 = vmatprep.subr.mxu1 %v2008_v18  ;;  %404 = vmatpush1.msra.mxu0 %v1916_v3 }
  0x45   :  { %302 = vmatpush1.msra.mxu1 %v2015_v19  ;;  %405 = vmatprep.subr.mxu0 %v1921_v4 }
  0x46   :  { %451 = vmatprep.mubr.f32.mxu0 %v1834_v0  ;;  %406 = vmatpush1.msra.mxu0 %v1927_v5 }
  0x47   :  { %519 = vmatprep.subr.mxu1 %v1911_v2  ;;  %407 = vmatprep.subr.mxu0 %v1934_v6 }
  0x48   :  { %408 = vmatpush1.msra.mxu0 %v1941_v7  ;;  %1608 = vset.pattern.permute.xlu1 %v1838_v59 }
  0x49   :  { %409 = vmatprep.subr.mxu0 %v1948_v8  ;;  %1609 = vset.pattern.permute.xlu0 %v1839_v60 }
  0x4a   :  { %410 = vmatpush1.msra.mxu0 %v1955_v9  ;;  %257 = vperm.xlu0 %1609, %v1960_v10  }
  0x4b   :  { %411 = vmatprep.subr.mxu0 %v1967_v11 }
  0x4c   :  { %412 = vmatpush1.msra.mxu0 %v1974_v12 }
  0x4d   :  { %413 = vmatprep.subr.mxu0 %v1981_v13 }
  0x4e   :  { %414 = vmatpush1.msra.mxu0 %v1988_v14 }
  0x4f   :  { %415 = vmatprep.subr.mxu0 %v1995_v15 }
  0x50   :  { %416 = vmatpush1.msra.mxu0 %v2001_v17 }
  0x51   :  { %417 = vmatprep.subr.mxu0 %v2008_v18 }
  0x52   :  { %418 = vmatpush1.msra.mxu0 %v2015_v19 }
  0x53   :  { %627 = vmatprep.subr.mxu0 %v1911_v2 }
  0xb3   :  { %v2048_v22 = vpop.permute.xlu0 %103 }
  0xb4   :  { %v117_v29 = vmul.f32 %v2050_v26, %v2048_v22  ;;  %v118_v41 = vmul.f32 %v2063_v38, %v2048_v22 }
  0xb8   :  { %v2054_v28 = vpop.permute.xlu0 %120 }
  0xb9   :  { %v134_v30 = vmul.f32 %v2052_v27, %v2054_v28  ;;  %v135_v42 = vmul.f32 %v2065_v39, %v2054_v28 }
  0xbb   :  { %v136_v32 = vadd.f32 %v134_v30, %v117_v29  ;;  %v137_v43 = vadd.f32 %v135_v42, %v118_v41 }
  0xbd   :  { %v149_v35 = vadd.f32 %v2060_v33, %v136_v32  ;;  %v150_v46 = vadd.f32 %v2071_v44, %v137_v43 }
  0xc5   :  { %v2101_v21 = vpop.permute.xlu0 %257 }
  0xc6   :  { %v260_v24 = vmul.f32 %v2101_v21, %v2052_v27 }
 0x102   :  { %v221_v36 = vpop.f32.mrf.mxu0 }
 0x103   :  { %v226_v37 = vadd.f32 %v221_v36, %v149_v35  ;;  %v261_v35 = vmul.f32 %v2101_v21, %v2065_v39 }
 0x104   :  { %v223_v45 = vpop.f32.mrf.mxu0 }
 0x105   :  { %v1445_v40 = vmul.f32 -1.442695, %v226_v37  ;;  %v227_v47 = vadd.f32 %v223_v45, %v150_v46 }
 0x107   :  { %1614 = vpow2.f32 %v1445_v40  ;;  %v1446_v53 = vmul.f32 -1.442695, %v227_v47 }
 0x108   :  { %1616 = vtanh.f32 %v227_v47 }
 0x114   :  { %v1615_v48 = vpop.eup %1614 }
 0x115   :  { %v231_v49 = vadd.f32 1.0, %v1615_v48  ;;  %v1617_v50 = vpop.eup %1616 }
 0x117   :  { %1618 = vrcp.f32 %v231_v49 }
 0x118   :  { %1620 = vpow2.f32 %v1446_v53 }
 0x124   :  { %v1619_v51 = vpop.eup %1618 }
 0x125   :  { %v242_v52 = vmul.f32 %v1619_v51, %v1617_v50  ;;  %v1621_v54 = vpop.eup %1620  ;;  %v241_v56 = vmul.f32 0.0, %v1619_v51 }
 0x126   :  { %v238_v55 = vadd.f32 1.0, %v1621_v54  ;;  %v1840_v54 = vmov 2  }
 0x127   :  { %244 = vrot.lane.b32.xlu1 %v242_v52, %s1837_s4  ;;  %1610 = vset.pattern.permute.xlu0 %v1840_v54  ;;  %v1843_v54 = vmov 3  }
 0x128   :  { %1622 = vrcp.f32 %v238_v55  ;;  %v1841_v55 = vmov 5   ;;  %367 = vperm.xlu0 %1610, %v1960_v10  }
 0x135   :  { %v1623_v61 = vpop.eup %1622 }
 0x199   :  { %v245_v57 = vpop.permute.xlu1 %244 }
 0x19a   :  { %v247_v58 = vadd.f32 %v245_v57, %v241_v56 }
 0x19c   :  { %1624 = vtanh.f32 %v247_v58 }
 0x1a9   :  { %v1625_v62 = vpop.eup %1624 }
 0x1aa   :  { %v249_v63 = vmul.f32 %v1625_v62, %v1623_v61  ;;  %v2140_v61 = vpop.permute.xlu0 %367 }
 0x1ac   :  { %267 = vrot.lane.b32.xlu1 %v249_v63, %s1837_s4  ;;  %v370_v63 = vmul.f32 %v2140_v61, %v2050_v26 }
 0x1b0   :  { %251 = vperm.xlu1 %1608, %v1960_v10  }
 0x1b4   :  { %1611 = vset.pattern.permute.xlu1 %v1841_v55 }
 0x21e   :  { %v2078_v1 = vpop.permute.xlu1 %267 }
 0x21f   :  { %1447 = vmatmul.mubr.msk.f32.vlgmr.msra.gmra.mxu1 %vm151_vm0, %v2078_v1 }
 0x220   :  { %520 = vmatpush1.msra.mxu1 %v1916_v3  ;;  %567 = vmatprep.mubr.f32.mxu1 %v1834_v0 }
 0x221   :  { %521 = vmatprep.subr.mxu1 %v1921_v4 }
 0x222   :  { %522 = vmatpush1.msra.mxu1 %v1927_v5 }
 0x223   :  { %523 = vmatprep.subr.mxu1 %v1934_v6 }
 0x224   :  { %524 = vmatpush1.msra.mxu1 %v1941_v7 }
 0x225   :  { %525 = vmatprep.subr.mxu1 %v1948_v8 }
 0x226   :  { %526 = vmatpush1.msra.mxu1 %v1955_v9 }
 0x227   :  { %527 = vmatprep.subr.mxu1 %v1967_v11 }
 0x228   :  { %528 = vmatpush1.msra.mxu1 %v1974_v12 }
 0x229   :  { %529 = vmatprep.subr.mxu1 %v1981_v13 }
 0x22a   :  { %530 = vmatpush1.msra.mxu1 %v1988_v14 }
 0x22b   :  { %531 = vmatprep.subr.mxu1 %v1995_v15  ;;  %v2099_v16 = vpop.permute.xlu1 %251 }
 0x22c   :  { %532 = vmatpush1.msra.mxu1 %v2001_v17  ;;  %v254_v23 = vmul.f32 %v2099_v16, %v2050_v26  ;;  %v255_v34 = vmul.f32 %v2099_v16, %v2063_v38 }
 0x22d   :  { %533 = vmatprep.subr.mxu1 %v2008_v18 }
 0x22e   :  { %534 = vmatpush1.msra.mxu1 %v2015_v19  ;;  %v262_v25 = vadd.f32 %v260_v24, %v254_v23  ;;  %v263_v36 = vadd.f32 %v261_v35, %v255_v34 }
 0x22f   :  { %735 = vmatprep.subr.mxu1 %v1911_v2 }
 0x230   :  { %v264_v29 = vadd.f32 %v262_v25, %v2060_v33  ;;  %v265_v40 = vadd.f32 %v263_v36, %v2071_v44 }
 0x2df   :  { %v337_v30 = vpop.f32.mrf.mxu1 }
 0x2e0   :  { %v342_v31 = vadd.f32 %v337_v30, %v264_v29 }
 0x2e1   :  { %v339_v37 = vpop.f32.mrf.mxu1 }
 0x2e2   :  { %v1448_v32 = vmul.f32 -1.442695, %v342_v31  ;;  %v343_v41 = vadd.f32 %v339_v37, %v265_v40 }
 0x2e4   :  { %1626 = vpow2.f32 %v1448_v32  ;;  %v1449_v48 = vmul.f32 -1.442695, %v343_v41  ;;  %v371_v32 = vmul.f32 %v2140_v61, %v2063_v38 }
 0x2e5   :  { %1628 = vtanh.f32 %v343_v41 }
 0x2f1   :  { %v1627_v42 = vpop.eup %1626 }
 0x2f2   :  { %v347_v43 = vadd.f32 1.0, %v1627_v42  ;;  %v1629_v45 = vpop.eup %1628 }
 0x2f4   :  { %1630 = vrcp.f32 %v347_v43 }
 0x2f5   :  { %1632 = vpow2.f32 %v1449_v48 }
 0x301   :  { %v1631_v46 = vpop.eup %1630 }
 0x302   :  { %v358_v47 = vmul.f32 %v1631_v46, %v1629_v45  ;;  %v1633_v49 = vpop.eup %1632  ;;  %v357_v51 = vmul.f32 %v1631_v46, %v247_v58 }
 0x303   :  { %v354_v50 = vadd.f32 1.0, %v1633_v49 }
 0x304   :  { %360 = vrot.lane.b32.xlu1 %v358_v47, %s1837_s4 }
 0x305   :  { %1634 = vrcp.f32 %v354_v50 }
 0x312   :  { %v1635_v56 = vpop.eup %1634 }
 0x376   :  { %v361_v52 = vpop.permute.xlu1 %360 }
 0x377   :  { %v363_v53 = vadd.f32 %v361_v52, %v357_v51  ;;  %v1842_v52 = vmov 4  }
 0x378   :  { %1613 = vset.pattern.permute.xlu0 %v1842_v52 }
 0x379   :  { %1636 = vtanh.f32 %v363_v53 }
 0x386   :  { %v1637_v57 = vpop.eup %1636 }
 0x387   :  { %v365_v59 = vmul.f32 %v1637_v57, %v1635_v56 }
 0x389   :  { %383 = vrot.lane.b32.xlu1 %v365_v59, %s1837_s4 }
 0x38d   :  { %373 = vperm.xlu1 %1611, %v1960_v10  }
 0x391   :  { %1612 = vset.pattern.permute.xlu1 %v1843_v54 }
 0x3fb   :  { %v2117_v60 = vpop.permute.xlu1 %383 }
 0x3fc   :  { %1450 = vmatmul.mubr.msk.f32.vlgmr.msra.gmra.mxu0 %vm151_vm0, %v2117_v60 }
 0x3fd   :  { %628 = vmatpush1.msra.mxu0 %v1916_v3  ;;  %675 = vmatprep.mubr.f32.mxu0 %v1834_v0 }
 0x3fe   :  { %629 = vmatprep.subr.mxu0 %v1921_v4 }
 0x3ff   :  { %630 = vmatpush1.msra.mxu0 %v1927_v5 }
 0x400   :  { %631 = vmatprep.subr.mxu0 %v1934_v6 }
 0x401   :  { %632 = vmatpush1.msra.mxu0 %v1941_v7 }
 0x402   :  { %633 = vmatprep.subr.mxu0 %v1948_v8 }
 0x403   :  { %634 = vmatpush1.msra.mxu0 %v1955_v9 }
 0x404   :  { %635 = vmatprep.subr.mxu0 %v1967_v11 }
 0x405   :  { %636 = vmatpush1.msra.mxu0 %v1974_v12 }
 0x406   :  { %637 = vmatprep.subr.mxu0 %v1981_v13 }
 0x407   :  { %638 = vmatpush1.msra.mxu0 %v1988_v14 }
 0x408   :  { %639 = vmatprep.subr.mxu0 %v1995_v15  ;;  %v2138_v58 = vpop.permute.xlu1 %373 }
 0x409   :  { %640 = vmatpush1.msra.mxu0 %v2001_v17  ;;  %v376_v62 = vmul.f32 %v2138_v58, %v2052_v27  ;;  %v377_v31 = vmul.f32 %v2138_v58, %v2065_v39 }
 0x40a   :  { %641 = vmatprep.subr.mxu0 %v2008_v18 }
 0x40b   :  { %642 = vmatpush1.msra.mxu0 %v2015_v19  ;;  %v378_v23 = vadd.f32 %v376_v62, %v370_v63  ;;  %v379_v34 = vadd.f32 %v377_v31, %v371_v32 }
 0x40c   :  { %843 = vmatprep.subr.mxu0 %v1911_v2 }
 0x40d   :  { %v380_v24 = vadd.f32 %v378_v23, %v2060_v33  ;;  %v381_v36 = vadd.f32 %v379_v34, %v2071_v44 }
 0x4bc   :  { %v453_v25 = vpop.f32.mrf.mxu0 }
 0x4bd   :  { %v458_v29 = vadd.f32 %v453_v25, %v380_v24 }
 0x4be   :  { %v455_v35 = vpop.f32.mrf.mxu0 }
 0x4bf   :  { %v1451_v30 = vmul.f32 -1.442695, %v458_v29  ;;  %v459_v37 = vadd.f32 %v455_v35, %v381_v36 }
 0x4c1   :  { %1638 = vpow2.f32 %v1451_v30  ;;  %v1452_v46 = vmul.f32 -1.442695, %v459_v37 }
 0x4c2   :  { %1640 = vtanh.f32 %v459_v37 }
 0x4ce   :  { %v1639_v40 = vpop.eup %1638 }
 0x4cf   :  { %v463_v41 = vadd.f32 1.0, %v1639_v40  ;;  %v1641_v42 = vpop.eup %1640 }
 0x4d1   :  { %1642 = vrcp.f32 %v463_v41 }
 0x4d2   :  { %1644 = vpow2.f32 %v1452_v46 }
 0x4de   :  { %v1643_v43 = vpop.eup %1642 }
 0x4df   :  { %v474_v45 = vmul.f32 %v1643_v43, %v1641_v42  ;;  %v1645_v47 = vpop.eup %1644  ;;  %v473_v49 = vmul.f32 %v1643_v43, %v363_v53 }
 0x4e0   :  { %v470_v48 = vadd.f32 1.0, %v1645_v47 }
 0x4e1   :  { %476 = vrot.lane.b32.xlu1 %v474_v45, %s1837_s4 }
 0x4e2   :  { %1646 = vrcp.f32 %v470_v48 }
 0x4e5   :  { %483 = vperm.xlu1 %1612, %v1960_v10  }
 0x4ef   :  { %v1647_v55 = vpop.eup %1646 }
 0x553   :  { %v477_v50 = vpop.permute.xlu1 %476 }
 0x554   :  { %v479_v51 = vadd.f32 %v477_v50, %v473_v49 }
 0x556   :  { %1648 = vtanh.f32 %v479_v51 }
 0x563   :  { %v1649_v56 = vpop.eup %1648 }
 0x564   :  { %v481_v57 = vmul.f32 %v1649_v56, %v1647_v55 }
 0x566   :  { %499 = vrot.lane.b32.xlu0 %v481_v57, %s1837_s4 }
 0x56a   :  { %489 = vperm.xlu0 %1613, %v1960_v10   ;;  %v2177_v10 = vpop.permute.xlu1 %483 }
 0x56b   :  { %v486_v62 = vmul.f32 %v2177_v10, %v2050_v26 }
 0x5d8   :  { %v2156_v59 = vpop.permute.xlu0 %499 }
 0x5d9   :  { %1453 = vmatmul.mubr.msk.f32.vlgmr.msra.gmra.mxu1 %vm151_vm0, %v2156_v59 }
 0x5da   :  { %736 = vmatpush1.msra.mxu1 %v1916_v3  ;;  %783 = vmatprep.mubr.f32.mxu1 %v1834_v0 }
 0x5db   :  { %737 = vmatprep.subr.mxu1 %v1921_v4 }
 0x5dc   :  { %738 = vmatpush1.msra.mxu1 %v1927_v5 }
 0x5dd   :  { %739 = vmatprep.subr.mxu1 %v1934_v6 }
 0x5de   :  { %740 = vmatpush1.msra.mxu1 %v1941_v7 }
 0x5df   :  { %741 = vmatprep.subr.mxu1 %v1948_v8 }
 0x5e0   :  { %742 = vmatpush1.msra.mxu1 %v1955_v9 }
 0x5e1   :  { %743 = vmatprep.subr.mxu1 %v1967_v11 }
 0x5e2   :  { %744 = vmatpush1.msra.mxu1 %v1974_v12 }
 0x5e3   :  { %745 = vmatprep.subr.mxu1 %v1981_v13 }
 0x5e4   :  { %746 = vmatpush1.msra.mxu1 %v1988_v14 }
 0x5e5   :  { %747 = vmatprep.subr.mxu1 %v1995_v15  ;;  %v2179_v53 = vpop.permute.xlu0 %489 }
 0x5e6   :  { %748 = vmatpush1.msra.mxu1 %v2001_v17  ;;  %v492_v63 = vmul.f32 %v2179_v53, %v2052_v27  ;;  %v493_v31 = vmul.f32 %v2179_v53, %v2065_v39  ;;  %v598_v57 = vmul.f32 %v2179_v53, %v2050_v26 }
 0x5e7   :  { %749 = vmatprep.subr.mxu1 %v2008_v18 }
 0x5e8   :  { %750 = vmatpush1.msra.mxu1 %v2015_v19  ;;  %v494_v23 = vadd.f32 %v492_v63, %v486_v62 }
 0x5e9   :  { %951 = vmatprep.subr.mxu1 %v1911_v2  ;;  %v487_v2 = vmul.f32 %v2177_v10, %v2063_v38 }
 0x5ea   :  { %v496_v24 = vadd.f32 %v494_v23, %v2060_v33 }
 0x5eb   :  { %v495_v32 = vadd.f32 %v493_v31, %v487_v2 }
 0x5ed   :  { %v497_v35 = vadd.f32 %v495_v32, %v2071_v44 }
 0x699   :  { %v569_v25 = vpop.f32.mrf.mxu1 }
 0x69a   :  { %v574_v29 = vadd.f32 %v569_v25, %v496_v24 }
 0x69b   :  { %v571_v34 = vpop.f32.mrf.mxu1 }
 0x69c   :  { %v1454_v30 = vmul.f32 -1.442695, %v574_v29  ;;  %v575_v36 = vadd.f32 %v571_v34, %v497_v35  ;;  %v601_v29 = vmul.f32 %v2177_v10, %v2065_v39 }
 0x69e   :  { %1650 = vpow2.f32 %v1454_v30  ;;  %v1455_v45 = vmul.f32 -1.442695, %v575_v36  ;;  %v599_v30 = vmul.f32 %v2179_v53, %v2063_v38 }
 0x69f   :  { %1652 = vtanh.f32 %v575_v36 }
 0x6a0   :  { %v603_v2 = vadd.f32 %v601_v29, %v599_v30  ;;  %v816_v29 = vmul.f32 %v2099_v16, %v2052_v27  ;;  %v814_v30 = vmul.f32 %v2101_v21, %v2050_v26 }
 0x6a2   :  { %v605_v32 = vadd.f32 %v603_v2, %v2071_v44  ;;  %v818_v2 = vadd.f32 %v816_v29, %v814_v30 }
 0x6ab   :  { %v1651_v37 = vpop.eup %1650 }
 0x6ac   :  { %v579_v40 = vadd.f32 1.0, %v1651_v37  ;;  %v1653_v41 = vpop.eup %1652 }
 0x6ae   :  { %1654 = vrcp.f32 %v579_v40 }
 0x6af   :  { %1656 = vpow2.f32 %v1455_v45 }
 0x6bb   :  { %v1655_v42 = vpop.eup %1654 }
 0x6bc   :  { %v590_v43 = vmul.f32 %v1655_v42, %v1653_v41  ;;  %v1657_v46 = vpop.eup %1656  ;;  %v589_v48 = vmul.f32 %v1655_v42, %v479_v51  ;;  %v600_v51 = vmul.f32 %v2177_v10, %v2052_v27 }
 0x6bd   :  { %v586_v47 = vadd.f32 1.0, %v1657_v46 }
 0x6be   :  { %592 = vrot.lane.b32.xlu1 %v590_v43, %s1837_s4  ;;  %v602_v62 = vadd.f32 %v600_v51, %v598_v57 }
 0x6bf   :  { %1658 = vrcp.f32 %v586_v47 }
 0x6c0   :  { %v604_v63 = vadd.f32 %v602_v62, %v2060_v33 }
 0x6cc   :  { %v1659_v52 = vpop.eup %1658 }
 0x730   :  { %v593_v49 = vpop.permute.xlu1 %592 }
 0x731   :  { %v595_v50 = vadd.f32 %v593_v49, %v589_v48 }
 0x733   :  { %1660 = vtanh.f32 %v595_v50 }
 0x740   :  { %v1661_v54 = vpop.eup %1660 }
 0x741   :  { %v597_v55 = vmul.f32 %v1661_v54, %v1659_v52 }
 0x743   :  { %607 = vrot.lane.b32.xlu1 %v597_v55, %s1837_s4 }
 0x7b5   :  { %v2193_v56 = vpop.permute.xlu1 %607 }
 0x7b6   :  { %1456 = vmatmul.mubr.msk.f32.vlgmr.msra.gmra.mxu0 %vm151_vm0, %v2193_v56 }
 0x7b7   :  { %844 = vmatpush1.msra.mxu0 %v1916_v3  ;;  %891 = vmatprep.mubr.f32.mxu0 %v1834_v0 }
 0x7b8   :  { %845 = vmatprep.subr.mxu0 %v1921_v4 }
 0x7b9   :  { %846 = vmatpush1.msra.mxu0 %v1927_v5 }
 0x7ba   :  { %847 = vmatprep.subr.mxu0 %v1934_v6 }
 0x7bb   :  { %848 = vmatpush1.msra.mxu0 %v1941_v7 }
 0x7bc   :  { %849 = vmatprep.subr.mxu0 %v1948_v8 }
 0x7bd   :  { %850 = vmatpush1.msra.mxu0 %v1955_v9 }
 0x7be   :  { %851 = vmatprep.subr.mxu0 %v1967_v11 }
 0x7bf   :  { %852 = vmatpush1.msra.mxu0 %v1974_v12 }
 0x7c0   :  { %853 = vmatprep.subr.mxu0 %v1981_v13 }
 0x7c1   :  { %854 = vmatpush1.msra.mxu0 %v1988_v14 }
 0x7c2   :  { %855 = vmatprep.subr.mxu0 %v1995_v15 }
 0x7c3   :  { %856 = vmatpush1.msra.mxu0 %v2001_v17 }
 0x7c4   :  { %857 = vmatprep.subr.mxu0 %v2008_v18 }
 0x7c5   :  { %858 = vmatpush1.msra.mxu0 %v2015_v19 }
 0x876   :  { %v677_v23 = vpop.f32.mrf.mxu0 }
 0x877   :  { %v682_v24 = vadd.f32 %v677_v23, %v604_v63 }
 0x878   :  { %v679_v31 = vpop.f32.mrf.mxu0 }
 0x879   :  { %v1457_v25 = vmul.f32 -1.442695, %v682_v24  ;;  %v683_v34 = vadd.f32 %v679_v31, %v605_v32  ;;  %v820_v31 = vadd.f32 %v818_v2, %v2060_v33  ;;  %v1052_v2 = vld [vmem:[#allocation7] sm:$0xff] }
 0x87b   :  { %1662 = vpow2.f32 %v1457_v25  ;;  %v1458_v42 = vmul.f32 -1.442695, %v683_v34 }
 0x87c   :  { %1664 = vtanh.f32 %v683_v34 }
 0x888   :  { %v1663_v35 = vpop.eup %1662 }
 0x889   :  { %v687_v36 = vadd.f32 1.0, %v1663_v35  ;;  %v1665_v37 = vpop.eup %1664 }
 0x88b   :  { %1666 = vrcp.f32 %v687_v36  ;;  %v817_v36 = vmul.f32 %v2099_v16, %v2065_v39 }
 0x88c   :  { %1668 = vpow2.f32 %v1458_v42 }
 0x898   :  { %v1667_v40 = vpop.eup %1666 }
 0x899   :  { %v698_v41 = vmul.f32 %v1667_v40, %v1665_v37  ;;  %v1669_v10 = vpop.eup %1668  ;;  %v697_v45 = vmul.f32 %v1667_v40, %v595_v50  ;;  %v815_v37 = vmul.f32 %v2101_v21, %v2063_v38 }
 0x89a   :  { %v694_v43 = vadd.f32 1.0, %v1669_v10 }
 0x89b   :  { %700 = vrot.lane.b32.xlu0 %v698_v41, %s1837_s4  ;;  %v819_v40 = vadd.f32 %v817_v36, %v815_v37  ;;  %v1218_v36 = vld [vmem:[%s2409_s7 + $0x70] sm:$0xff]  ;;  %v1217_v37 = vld [vmem:[%s2409_s7 + $0x68] sm:$0xff] }
 0x89c   :  { %1670 = vrcp.f32 %v694_v43 }
 0x89d   :  { %v821_v42 = vadd.f32 %v819_v40, %v2071_v44  ;;  %v1216_v40 = vld [vmem:[%s2409_s7 + $0x60] sm:$0xff] }
 0x8a9   :  { %v1671_v47 = vpop.eup %1670 }
 0x90d   :  { %v701_v53 = vpop.permute.xlu0 %700 }
 0x90e   :  { %v703_v46 = vadd.f32 %v701_v53, %v697_v45 }
 0x910   :  { %1672 = vtanh.f32 %v703_v46 }
 0x91d   :  { %v1673_v48 = vpop.eup %1672 }
 0x91e   :  { %v705_v49 = vmul.f32 %v1673_v48, %v1671_v47 }
 0x920   :  { %715 = vrot.lane.b32.xlu1 %v705_v49, %s1837_s4 }
 0x992   :  { %v2225_v52 = vpop.permute.xlu1 %715 }
 0x993   :  { %1459 = vmatmul.mubr.msk.f32.vlgmr.msra.gmra.mxu1 %vm151_vm0, %v2225_v52 }
 0x994   :  { %952 = vmatpush1.msra.mxu1 %v1916_v3  ;;  %999 = vmatprep.mubr.f32.mxu1 %v1834_v0  ;;  %v706_v0 = vmul.f32 %v2138_v58, %v2050_v26  ;;  %v708_v3 = vmul.f32 %v2140_v61, %v2052_v27 }
 0x995   :  { %953 = vmatprep.subr.mxu1 %v1921_v4 }
 0x996   :  { %954 = vmatpush1.msra.mxu1 %v1927_v5  ;;  %v710_v4 = vadd.f32 %v708_v3, %v706_v0 }
 0x997   :  { %955 = vmatprep.subr.mxu1 %v1934_v6 }
 0x998   :  { %956 = vmatpush1.msra.mxu1 %v1941_v7  ;;  %v712_v5 = vadd.f32 %v710_v4, %v2060_v33 }
 0x999   :  { %957 = vmatprep.subr.mxu1 %v1948_v8 }
 0x99a   :  { %958 = vmatpush1.msra.mxu1 %v1955_v9  ;;  %v707_v9 = vmul.f32 %v2138_v58, %v2063_v38 }
 0x99b   :  { %959 = vmatprep.subr.mxu1 %v1967_v11  ;;  %v709_v11 = vmul.f32 %v2140_v61, %v2065_v39 }
 0x99c   :  { %960 = vmatpush1.msra.mxu1 %v1974_v12 }
 0x99d   :  { %961 = vmatprep.subr.mxu1 %v1981_v13  ;;  %v711_v12 = vadd.f32 %v709_v11, %v707_v9  ;;  %v922_v9 = vmul.f32 %v2054_v28, %v2050_v26 }
 0x99e   :  { %962 = vmatpush1.msra.mxu1 %v1988_v14 }
 0x99f   :  { %963 = vmatprep.subr.mxu1 %v1995_v15  ;;  %v713_v14 = vadd.f32 %v711_v12, %v2071_v44 }
 0x9a0   :  { %964 = vmatpush1.msra.mxu1 %v2001_v17 }
 0x9a1   :  { %965 = vmatprep.subr.mxu1 %v2008_v18 }
 0x9a2   :  { %966 = vmatpush1.msra.mxu1 %v2015_v19 }
 0xa53   :  { %v785_v6 = vpop.f32.mrf.mxu1 }
 0xa54   :  { %v790_v7 = vadd.f32 %v785_v6, %v712_v5 }
 0xa55   :  { %v787_v13 = vpop.f32.mrf.mxu1 }
 0xa56   :  { %v1460_v8 = vmul.f32 -1.442695, %v790_v7  ;;  %v791_v15 = vadd.f32 %v787_v13, %v713_v14 }
 0xa58   :  { %1674 = vpow2.f32 %v1460_v8  ;;  %v1461_v55 = vmul.f32 -1.442695, %v791_v15  ;;  %v924_v8 = vmul.f32 %v2052_v27, %v2048_v22 }
 0xa59   :  { %1676 = vtanh.f32 %v791_v15 }
 0xa5a   :  { %v926_v11 = vadd.f32 %v924_v8, %v922_v9 }
 0xa5c   :  { %v928_v12 = vadd.f32 %v926_v11, %v2060_v33 }
 0xa65   :  { %v1675_v17 = vpop.eup %1674 }
 0xa66   :  { %v795_v18 = vadd.f32 1.0, %v1675_v17  ;;  %v1677_v19 = vpop.eup %1676  ;;  %v925_v17 = vmul.f32 %v2065_v39, %v2048_v22  ;;  %v1057_v22 = vld [vmem:[#allocation7 + $0x28] sm:$0xff]  ;;  %v1054_v39 = vld [vmem:[#allocation7 + $0x10] sm:$0xff] }
 0xa68   :  { %1678 = vrcp.f32 %v795_v18  ;;  %v923_v18 = vmul.f32 %v2054_v28, %v2063_v38  ;;  %v1056_v28 = vld [vmem:[#allocation7 + $0x20] sm:$0xff]  ;;  %v1055_v38 = vld [vmem:[#allocation7 + $0x18] sm:$0xff] }
 0xa69   :  { %1680 = vpow2.f32 %v1461_v55 }
 0xa75   :  { %v1679_v50 = vpop.eup %1678 }
 0xa76   :  { %v806_v54 = vmul.f32 %v1679_v50, %v1677_v19  ;;  %v1681_v58 = vpop.eup %1680  ;;  %v805_v57 = vmul.f32 %v1679_v50, %v703_v46  ;;  %v927_v19 = vadd.f32 %v925_v17, %v923_v18 }
 0xa77   :  { %v802_v51 = vadd.f32 1.0, %v1681_v58 }
 0xa78   :  { %808 = vrot.lane.b32.xlu0 %v806_v54, %s1837_s4  ;;  %v929_v27 = vadd.f32 %v927_v19, %v2071_v44  ;;  %v1053_v44 = vld [vmem:[#allocation7 + $0x8] sm:$0xff] }
 0xa79   :  { %1682 = vrcp.f32 %v802_v51 }
 0xa86   :  { %v1683_v63 = vpop.eup %1682 }
 0xaea   :  { %v809_v61 = vpop.permute.xlu0 %808 }
 0xaeb   :  { %v811_v62 = vadd.f32 %v809_v61, %v805_v57  ;;  %v1059_v57 = vld [vmem:[#allocation7 + $0x38] sm:$0xff]  ;;  %v1058_v61 = vld [vmem:[#allocation7 + $0x30] sm:$0xff] }
 0xaec   :  { %1518 = vmatprep.subr.mxu0 %v1059_v57 }
 0xaed   :  { %1684 = vtanh.f32 %v811_v62 }
 0xafa   :  { %v1685_v23 = vpop.eup %1684 }
 0xafb   :  { %v813_v24 = vmul.f32 %v1685_v23, %v1683_v63 }
 0xafd   :  { %823 = vrot.lane.b32.xlu1 %v813_v24, %s1837_s4 }
 0xb6f   :  { %v2257_v25 = vpop.permute.xlu1 %823 }
 0xb70   :  { %1462 = vmatmul.mubr.msk.f32.vlgmr.msra.gmra.mxu0 %vm151_vm0, %v2257_v25 }
 0xb71   :  { %1519 = vmatpush3.msra.mxu0 %v1059_v57 }
 0xb72   :  { %1520 = vmatprep.subr.mxu0 %v1058_v61 }
 0xb73   :  { %1521 = vmatpush3.msra.mxu0 %v1058_v61 }
 0xb74   :  { %1522 = vmatprep.subr.mxu0 %v1057_v22 }
 0xb75   :  { %1523 = vmatpush3.msra.mxu0 %v1057_v22 }
 0xb76   :  { %1524 = vmatprep.subr.mxu0 %v1056_v28 }
 0xb77   :  { %1525 = vmatpush3.msra.mxu0 %v1056_v28 }
 0xb78   :  { %1526 = vmatprep.subr.mxu0 %v1055_v38 }
 0xb79   :  { %1527 = vmatpush3.msra.mxu0 %v1055_v38  ;;  %v1477_v38 = vld [vmem:[%s2410_s8] ss:$0 sm:$0xff] }
 0xb7a   :  { %1528 = vmatprep.subr.mxu0 %v1054_v39 }
 0xb7b   :  { %1529 = vmatpush3.msra.mxu0 %v1054_v39 }
 0xb7c   :  { %1530 = vmatprep.subr.mxu0 %v1053_v44 }
 0xb7d   :  { %1531 = vmatpush3.msra.mxu0 %v1053_v44 }
 0xb7e   :  { %1532 = vmatprep.subr.mxu0 %v1052_v2 }
 0xb7f   :  { %1533 = vmatpush3.msra.mxu0 %v1052_v2 }
 0xc30   :  { %v893_v32 = vpop.f32.mrf.mxu0 }
 0xc31   :  { %v898_v34 = vadd.f32 %v893_v32, %v820_v31 }
 0xc32   :  { %v895_v41 = vpop.f32.mrf.mxu0 }
 0xc33   :  { %v1463_v35 = vmul.f32 -1.442695, %v898_v34  ;;  %v899_v10 = vadd.f32 %v895_v41, %v821_v42  ;;  %v1215_v41 = vld [vmem:[%s2409_s7 + $0x58] sm:$0xff]  ;;  %v1214_v42 = vld [vmem:[%s2409_s7 + $0x50] sm:$0xff] }
 0xc35   :  { %1686 = vpow2.f32 %v1463_v35  ;;  %v1464_v48 = vmul.f32 -1.442695, %v899_v10  ;;  %v1219_v35 = vld [vmem:[%s2409_s7 + $0x78] sm:$0xff] }
 0xc36   :  { %1688 = vtanh.f32 %v899_v10  ;;  %1546 = vmatprep.subr.mxu1 %v1219_v35  ;;  %v1213_v10 = vld [vmem:[%s2409_s7 + $0x48] sm:$0xff] }
 0xc42   :  { %v1687_v43 = vpop.eup %1686 }
 0xc43   :  { %v903_v45 = vadd.f32 1.0, %v1687_v43  ;;  %v1689_v53 = vpop.eup %1688  ;;  %v1212_v43 = vld [vmem:[%s2409_s7 + $0x40] sm:$0xff] }
 0xc45   :  { %1690 = vrcp.f32 %v903_v45  ;;  %v1211_v45 = vld [vmem:[%s2409_s7 + $0x38] sm:$0xff] }
 0xc46   :  { %1692 = vpow2.f32 %v1464_v48  ;;  %v1031_v48 = vand.u32 127, %v107_v20 }
 0xc48   :  { %vm1032_vm1 = vcmp.lt.s32.totalorder %v1031_v48, 32 }
 0xc49   :  { %v1047_v20 = vsel %vm1032_vm1, %v2193_v56, %v2225_v52 }
 0xc52   :  { %v1691_v46 = vpop.eup %1690 }
 0xc53   :  { %v914_v47 = vmul.f32 %v1691_v46, %v1689_v53  ;;  %v1693_v16 = vpop.eup %1692  ;;  %v913_v0 = vmul.f32 %v1691_v46, %v811_v62  ;;  %v1210_v53 = vld [vmem:[%s2409_s7 + $0x30] sm:$0xff]  ;;  %v1209_v46 = vld [vmem:[%s2409_s7 + $0x28] sm:$0xff] }
 0xc54   :  { %v910_v49 = vadd.f32 1.0, %v1693_v16 }
 0xc55   :  { %916 = vrot.lane.b32.xlu0 %v914_v47, %s1837_s4  ;;  %v1208_v47 = vld [vmem:[%s2409_s7 + $0x20] sm:$0xff] }
 0xc56   :  { %1694 = vrcp.f32 %v910_v49 }
 0xc63   :  { %v1695_v4 = vpop.eup %1694 }
 0xcc7   :  { %v917_v21 = vpop.permute.xlu0 %916 }
 0xcc8   :  { %v919_v3 = vadd.f32 %v917_v21, %v913_v0  ;;  %v1044_v21 = vsel %vm1032_vm1, %v2156_v59, %v2257_v25 }
 0xcca   :  { %1696 = vtanh.f32 %v919_v3 }
 0xcd7   :  { %v1697_v5 = vpop.eup %1696 }
 0xcd8   :  { %v921_v6 = vmul.f32 %v1697_v5, %v1695_v4  ;;  %v1049_v4 = vsel %vm1032_vm1, %v2257_v25, %v2156_v59  ;;  %v1206_v59 = vld [vmem:[%s2409_s7 + $0x10] sm:$0xff] }
 0xcda   :  { %931 = vrot.lane.b32.xlu1 %v921_v6, %s1837_s4 }
 0xd4c   :  { %v2273_v7 = vpop.permute.xlu1 %931 }
 0xd4d   :  { %1465 = vmatmul.mubr.msk.f32.vlgmr.msra.gmra.mxu1 %vm151_vm0, %v2273_v7  ;;  %v1041_v0 = vsel %vm1032_vm1, %v2117_v60, %v2273_v7  ;;  %v1050_v5 = vsel %vm1032_vm1, %v2273_v7, %v2117_v60  ;;  %v1205_v60 = vld [vmem:[%s2409_s7 + $0x8] sm:$0xff] }
 0xd4e   :  { %1547 = vmatpush3.msra.mxu1 %v1219_v35 }
 0xd4f   :  { %1548 = vmatprep.subr.mxu1 %v1218_v36 }
 0xd50   :  { %1549 = vmatpush3.msra.mxu1 %v1218_v36 }
 0xd51   :  { %1550 = vmatprep.subr.mxu1 %v1217_v37 }
 0xd52   :  { %1551 = vmatpush3.msra.mxu1 %v1217_v37 }
 0xd53   :  { %1552 = vmatprep.subr.mxu1 %v1216_v40 }
 0xd54   :  { %1553 = vmatpush3.msra.mxu1 %v1216_v40 }
 0xd55   :  { %1554 = vmatprep.subr.mxu1 %v1215_v41 }
 0xd56   :  { %1555 = vmatpush3.msra.mxu1 %v1215_v41 }
 0xd57   :  { %1556 = vmatprep.subr.mxu1 %v1214_v42 }
 0xd58   :  { %1557 = vmatpush3.msra.mxu1 %v1214_v42 }
 0xd59   :  { %1558 = vmatprep.subr.mxu1 %v1213_v10 }
 0xd5a   :  { %1559 = vmatpush3.msra.mxu1 %v1213_v10 }
 0xd5b   :  { %1560 = vmatprep.subr.mxu1 %v1212_v43 }
 0xd5c   :  { %1561 = vmatpush3.msra.mxu1 %v1212_v43 }
 0xd5d   :  { %1562 = vmatprep.subr.mxu1 %v1211_v45 }
 0xd5e   :  { %1563 = vmatpush3.msra.mxu1 %v1211_v45 }
 0xd5f   :  { %1564 = vmatprep.subr.mxu1 %v1210_v53 }
 0xd60   :  { %1565 = vmatpush3.msra.mxu1 %v1210_v53 }
 0xd61   :  { %1566 = vmatprep.subr.mxu1 %v1209_v46 }
 0xd62   :  { %1567 = vmatpush3.msra.mxu1 %v1209_v46 }
 0xd63   :  { %1568 = vmatprep.subr.mxu1 %v1208_v47 }
 0xd64   :  { %1569 = vmatpush3.msra.mxu1 %v1208_v47 }
 0xe0d   :  { %v1001_v13 = vpop.f32.mrf.mxu1 }
 0xe0e   :  { %v1006_v14 = vadd.f32 %v1001_v13, %v928_v12 }
 0xe0f   :  { %v1003_v50 = vpop.f32.mrf.mxu1 }
 0xe10   :  { %v1466_v15 = vmul.f32 -1.442695, %v1006_v14  ;;  %v1007_v54 = vadd.f32 %v1003_v50, %v929_v27 }
 0xe12   :  { %1698 = vpow2.f32 %v1466_v15  ;;  %v1467_v62 = vmul.f32 -1.442695, %v1007_v54 }
 0xe13   :  { %1700 = vtanh.f32 %v1007_v54 }
 0xe1f   :  { %v1699_v55 = vpop.eup %1698 }
 0xe20   :  { %v1011_v26 = vadd.f32 1.0, %v1699_v55  ;;  %v1701_v33 = vpop.eup %1700 }
 0xe22   :  { %1702 = vrcp.f32 %v1011_v26 }
 0xe23   :  { %1704 = vpow2.f32 %v1467_v62 }
 0xe2f   :  { %v1703_v58 = vpop.eup %1702 }
 0xe30   :  { %v1022_v51 = vmul.f32 %v1703_v58, %v1701_v33  ;;  %v1705_v63 = vpop.eup %1704  ;;  %v1021_v24 = vmul.f32 %v1703_v58, %v919_v3  ;;  %v1048_v3 = vsel %vm1032_vm1, %v2225_v52, %v2193_v56  ;;  %v1207_v56 = vld [vmem:[%s2409_s7 + $0x18] sm:$0xff]  ;;  %v1468_v52 = vld [vmem:[%s2408_s6] ss:$0 sm:$0xff] }
 0xe31   :  { %v1018_v23 = vadd.f32 1.0, %v1705_v63  ;;  %1570 = vmatprep.subr.mxu1 %v1207_v56 }
 0xe32   :  { %1024 = vrot.lane.b32.xlu0 %v1022_v51, %s1837_s4  ;;  %1571 = vmatpush3.msra.mxu1 %v1207_v56 }
 0xe33   :  { %1706 = vrcp.f32 %v1018_v23  ;;  %1572 = vmatprep.subr.mxu1 %v1206_v59 }
 0xe34   :  { %1573 = vmatpush3.msra.mxu1 %v1206_v59 }
 0xe35   :  { %1574 = vmatprep.subr.mxu1 %v1205_v60 }
 0xe36   :  { %1575 = vmatpush3.msra.mxu1 %v1205_v60 }
 0xe40   :  { %v1707_v31 = vpop.eup %1706 }
 0xea4   :  { %v1025_v29 = vpop.permute.xlu0 %1024 }
 0xea5   :  { %v1027_v30 = vadd.f32 %v1025_v29, %v1021_v24 }
 0xea7   :  { %1708 = vtanh.f32 %v1027_v30 }
 0xeb4   :  { %v1709_v32 = vpop.eup %1708 }
 0xeb5   :  { %v1029_v34 = vmul.f32 %v1709_v32, %v1707_v31 }
 0xeb7   :  { %1035 = vrot.lane.b32.xlu1 %v1029_v34, %s1837_s4 }
 0xf29   :  { %v1036_v16 = vpop.permute.xlu1 %1035 }
 0xf2a   :  { %v1038_v49 = vsel %vm1032_vm1, %v2078_v1, %v1036_v16  ;;  %v1051_v6 = vsel %vm1032_vm1, %v1036_v16, %v2078_v1  ;;  %v1204_v1 = vld [vmem:[%s2409_s7] sm:$0xff] }
 0xf2b   :  { %1534 = vmatprep.mubr.msk.f32.mxu0 %vm151_vm0, %v1038_v49  ;;  %1576 = vmatprep.subr.mxu1 %v1204_v1 }
 0xf2c   :  { %1535 = vmatmul.mubr.msk.f32.vlgmr.msra.gmra.mxu0 %vm151_vm0, %v1041_v0  ;;  %1577 = vmatpush3.msra.mxu1 %v1204_v1 }
 0xf2d   :  { %1537 = vmatprep.mubr.msk.f32.mxu0 %vm151_vm0, %v1044_v21 }
 0xf30   :  { %1538 = vmatmul.mubr.msk.f32.gmra.mxu0 %vm151_vm0, %v1047_v20 }
 0xf31   :  { %1540 = vmatprep.mubr.msk.f32.mxu0 %vm151_vm0, %v1048_v3 }
 0xf34   :  { %1541 = vmatmul.mubr.msk.f32.gmra.mxu0 %vm151_vm0, %v1049_v4 }
 0xf35   :  { %1543 = vmatprep.mubr.msk.f32.mxu0 %vm151_vm0, %v1050_v5 }
 0xf38   :  { %1544 = vmatmul.mubr.msk.f32.gmra.mxu0 %vm151_vm0, %v1051_v6 }
 0xfec   :  { %v1536_v25 = vpop.f32.mrf.mxu0 }
 0xfed   :  { %v1163_v7 = vadd.f32 %v1536_v25, %v1468_v52 }
 0xfee   :  { %v1157_v8 = vpop.f32.mrf.mxu0 }
 0xfef   :  { %v1158_v9 = vadd.f32 %v1468_v52, %v1157_v8  ;;  %v1197_v13 = vmax.f32 %v1163_v7, 0.0 }
 0xff0   :  { %v1539_v11 = vpop.f32.mrf.mxu0 }
 0xff1   :  { %v1196_v12 = vmax.f32 %v1158_v9, 0.0  ;;  %v1173_v14 = vadd.f32 %v1539_v11, %v1468_v52 }
 0xff2   :  { %v1167_v15 = vpop.f32.mrf.mxu0 }
 0xff3   :  { %v1168_v17 = vadd.f32 %v1468_v52, %v1167_v15  ;;  %1578 = vmatprep.mubr.f32.mxu1 %v1196_v12  ;;  %v1199_v50 = vmax.f32 %v1173_v14, 0.0 }
 0xff4   :  { %v1542_v18 = vpop.f32.mrf.mxu0  ;;  %1579 = vmatmul.mubr.f32.vlgmr.msra.gmra.mxu1 %v1197_v13 }
 0xff5   :  { %v1198_v19 = vmax.f32 %v1168_v17, 0.0  ;;  %v1183_v27 = vadd.f32 %v1542_v18, %v1468_v52 }
 0xff6   :  { %v1177_v54 = vpop.f32.mrf.mxu0 }
 0xff7   :  { %v1178_v55 = vadd.f32 %v1468_v52, %v1177_v54  ;;  %1581 = vmatprep.mubr.f32.mxu1 %v1198_v19  ;;  %v1201_v58 = vmax.f32 %v1183_v27, 0.0 }
 0xff8   :  { %v1545_v26 = vpop.f32.mrf.mxu0  ;;  %1582 = vmatmul.mubr.f32.gmra.mxu1 %v1199_v50 }
 0xff9   :  { %v1200_v33 = vmax.f32 %v1178_v55, 0.0  ;;  %v1193_v51 = vadd.f32 %v1545_v26, %v1468_v52 }
 0xffa   :  { %v1187_v57 = vpop.f32.mrf.mxu0 }
 0xffb   :  { %v1188_v61 = vadd.f32 %v1468_v52, %v1187_v57  ;;  %1584 = vmatprep.mubr.f32.mxu1 %v1200_v33  ;;  %v1203_v28 = vmax.f32 %v1193_v51, 0.0 }
 0xffc   :  { %1585 = vmatmul.mubr.f32.gmra.mxu1 %v1201_v58 }
 0xffd   :  { %v1202_v22 = vmax.f32 %v1188_v61, 0.0 }
 0xfff   :  { %1587 = vmatprep.mubr.f32.mxu1 %v1202_v22 }
0x1000   :  { %1588 = vmatmul.mubr.f32.gmra.mxu1 %v1203_v28 }
0x10b4   :  { %v1580_v39 = vpop.f32.mrf.mxu1 }
0x10b5   :  { %v1299_v44 = vadd.f32 %v1580_v39, %v1477_v38 }
0x10b6   :  { %v1293_v62 = vpop.f32.mrf.mxu1 }
0x10b7   :  { %v1294_v63 = vadd.f32 %v1477_v38, %v1293_v62  ;;  %v1336_v23 = vsel %vm1332_vm2, %v1299_v44, -inf }
0x10b8   :  { %1337 = vmax.xlane.f32.xlu1 %v1336_v23  ;;  %v1583_v24 = vpop.f32.mrf.mxu1 }
0x10b9   :  { %v1333_v29 = vsel %vm1332_vm2, %v1294_v63, -inf  ;;  %v1309_v32 = vadd.f32 %v1583_v24, %v1477_v38 }
0x10ba   :  { %1334 = vmax.xlane.f32.xlu0 %v1333_v29  ;;  %v1303_v30 = vpop.f32.mrf.mxu1 }
0x10bb   :  { %v1304_v2 = vadd.f32 %v1477_v38, %v1303_v30  ;;  %v1342_v42 = vsel %vm1332_vm2, %v1309_v32, -inf }
0x10bc   :  { %v1586_v31 = vpop.f32.mrf.mxu1 }
0x10bd   :  { %v1339_v34 = vsel %vm1332_vm2, %v1304_v2, -inf  ;;  %v1319_v40 = vadd.f32 %v1586_v31, %v1477_v38 }
0x10be   :  { %v1313_v35 = vpop.f32.mrf.mxu1  ;;  %1340 = vmax.xlane.f32.xlu0 %v1339_v34 }
0x10bf   :  { %v1314_v36 = vadd.f32 %v1477_v38, %v1313_v35  ;;  %v1348_v46 = vsel %vm1332_vm2, %v1319_v40, -inf }
0x10c0   :  { %v1589_v37 = vpop.f32.mrf.mxu1 }
0x10c1   :  { %v1345_v41 = vsel %vm1332_vm2, %v1314_v36, -inf  ;;  %v1329_v45 = vadd.f32 %v1589_v37, %v1477_v38 }
0x10c2   :  { %v1323_v10 = vpop.f32.mrf.mxu1  ;;  %1346 = vmax.xlane.f32.xlu1 %v1345_v41  ;;  %1343 = vmax.xlane.f32.xlu0 %v1342_v42 }
0x10c3   :  { %v1324_v43 = vadd.f32 %v1477_v38, %v1323_v10  ;;  %v1354_v47 = vsel %vm1332_vm2, %v1329_v45, -inf }
0x10c5   :  { %v1351_v53 = vsel %vm1332_vm2, %v1324_v43, -inf }
0x10c6   :  { %1352 = vmax.xlane.f32.xlu1 %v1351_v53  ;;  %1349 = vmax.xlane.f32.xlu0 %v1348_v46 }
0x10ca   :  { %1355 = vmax.xlane.f32.xlu0 %v1354_v47 }
0x1141   :  { %v1338_v48 = vpop.xlane.xlu1 %1337 }
0x1142   :  { %v1358_v16 = vsub.f32 %v1299_v44, %v1338_v48 }
0x1143   :  { %v1335_v49 = vpop.xlane.xlu0 %1334 }
0x1144   :  { %v1367_v0 = vmul.f32 1.442695, %v1358_v16  ;;  %v1357_v21 = vsub.f32 %v1294_v63, %v1335_v49 }
0x1146   :  { %1710 = vpow2.f32 %v1367_v0  ;;  %v1365_v20 = vmul.f32 1.442695, %v1357_v21 }
0x1147   :  { %v1341_v3 = vpop.xlane.xlu0 %1340 }
0x1148   :  { %1712 = vpow2.f32 %v1365_v20  ;;  %v1359_v4 = vsub.f32 %v1304_v2, %v1341_v3 }
0x114a   :  { %v1369_v5 = vmul.f32 1.442695, %v1359_v4 }
0x114b   :  { %v1347_v6 = vpop.xlane.xlu1 %1346  ;;  %v1344_v56 = vpop.xlane.xlu0 %1343 }
0x114c   :  { %1714 = vpow2.f32 %v1369_v5  ;;  %v1361_v59 = vsub.f32 %v1314_v36, %v1347_v6  ;;  %v1360_v60 = vsub.f32 %v1309_v32, %v1344_v56 }
0x114e   :  { %v1373_v1 = vmul.f32 1.442695, %v1361_v59  ;;  %v1371_v52 = vmul.f32 1.442695, %v1360_v60 }
0x114f   :  { %v1353_v25 = vpop.xlane.xlu1 %1352  ;;  %v1350_v7 = vpop.xlane.xlu0 %1349 }
0x1150   :  { %1716 = vpow2.f32 %v1373_v1  ;;  %v1363_v8 = vsub.f32 %v1324_v43, %v1353_v25  ;;  %v1362_v9 = vsub.f32 %v1319_v40, %v1350_v7 }
0x1151   :  { %1718 = vpow2.f32 %v1371_v52 }
0x1152   :  { %v1377_v11 = vmul.f32 1.442695, %v1363_v8  ;;  %v1375_v12 = vmul.f32 1.442695, %v1362_v9 }
0x1153   :  { %v1711_v13 = vpop.eup %1710  ;;  %v1356_v14 = vpop.xlane.xlu0 %1355 }
0x1154   :  { %1720 = vpow2.f32 %v1377_v11  ;;  %v1364_v15 = vsub.f32 %v1329_v45, %v1356_v14  ;;  %v1384_v17 = vsel %vm1332_vm2, %v1711_v13, 0.0 }
0x1155   :  { %v1713_v18 = vpop.eup %1712  ;;  %1722 = vpow2.f32 %v1375_v12  ;;  %1385 = vadd.xlane.f32.xlu0 %v1384_v17 }
0x1156   :  { %v1379_v19 = vmul.f32 1.442695, %v1364_v15  ;;  %v1381_v50 = vsel %vm1332_vm2, %v1713_v18, 0.0 }
0x1157   :  { %1382 = vadd.xlane.f32.xlu1 %v1381_v50 }
0x1158   :  { %1724 = vpow2.f32 %v1379_v19 }
0x1159   :  { %v1715_v27 = vpop.eup %1714 }
0x115a   :  { %v1387_v54 = vsel %vm1332_vm2, %v1715_v27, 0.0 }
0x115b   :  { %1388 = vadd.xlane.f32.xlu1 %v1387_v54 }
0x115d   :  { %v1717_v55 = vpop.eup %1716 }
0x115e   :  { %v1719_v26 = vpop.eup %1718  ;;  %v1393_v33 = vsel %vm1332_vm2, %v1717_v55, 0.0 }
0x115f   :  { %1394 = vadd.xlane.f32.xlu1 %v1393_v33  ;;  %v1390_v58 = vsel %vm1332_vm2, %v1719_v26, 0.0 }
0x1160   :  { %1391 = vadd.xlane.f32.xlu0 %v1390_v58 }
0x1161   :  { %v1721_v51 = vpop.eup %1720 }
0x1162   :  { %v1723_v57 = vpop.eup %1722  ;;  %v1399_v61 = vsel %vm1332_vm2, %v1721_v51, 0.0 }
0x1163   :  { %1400 = vadd.xlane.f32.xlu1 %v1399_v61  ;;  %v1396_v22 = vsel %vm1332_vm2, %v1723_v57, 0.0 }
0x1164   :  { %1397 = vadd.xlane.f32.xlu0 %v1396_v22 }
0x1165   :  { %v1725_v28 = vpop.eup %1724 }
0x1166   :  { %v1402_v38 = vsel %vm1332_vm2, %v1725_v28, 0.0 }
0x1168   :  { %1403 = vadd.xlane.f32.xlu0 %v1402_v38 }
0x11de   :  { %v1386_v39 = vpop.xlane.xlu0 %1385 }
0x11e0   :  { %v1383_v44 = vpop.xlane.xlu1 %1382 }
0x11e1   :  { %1726 = vrcp.f32 %v1383_v44 }
0x11e2   :  { %1728 = vrcp.f32 %v1386_v39 }
0x11e4   :  { %v1389_v62 = vpop.xlane.xlu1 %1388 }
0x11e5   :  { %1730 = vrcp.f32 %v1389_v62 }
0x11e8   :  { %v1395_v63 = vpop.xlane.xlu1 %1394 }
0x11e9   :  { %1732 = vrcp.f32 %v1395_v63  ;;  %v1392_v23 = vpop.xlane.xlu0 %1391 }
0x11ea   :  { %1734 = vrcp.f32 %v1392_v23 }
0x11ec   :  { %v1401_v24 = vpop.xlane.xlu1 %1400 }
0x11ed   :  { %1736 = vrcp.f32 %v1401_v24  ;;  %v1398_v29 = vpop.xlane.xlu0 %1397 }
0x11ee   :  { %v1727_v30 = vpop.eup %1726  ;;  %1738 = vrcp.f32 %v1398_v29 }
0x11ef   :  { %v1729_v2 = vpop.eup %1728  ;;  %v1413_v31 = vmul.f32 %v1727_v30, %v1713_v18 }
0x11f0   :  { %v1414_v35 = vmul.f32 %v1729_v2, %v1711_v13 }
0x11f1   :  { %v1404_v32 = vpop.xlane.xlu0 %1403  ;;  %v1421_v37 = vsel %vm1332_vm2, %v1413_v31, 0.0 }
0x11f2   :  { %v1731_v34 = vpop.eup %1730  ;;  %1740 = vrcp.f32 %v1404_v32  ;;  %v1422_v41 = vsel %vm1332_vm2, %v1414_v35, 0.0 }
0x11f3   :  { %v1415_v36 = vmul.f32 %v1731_v34, %v1715_v27  ;;  %v1423_v43 = vadd.f32 %v1422_v41, %v1421_v37 }
0x11f5   :  { %v1424_v42 = vsel %vm1332_vm2, %v1415_v36, 0.0 }
0x11f6   :  { %v1733_v40 = vpop.eup %1732  ;;  %v1425_v46 = vadd.f32 %v1424_v42, %v1423_v43 }
0x11f7   :  { %v1735_v10 = vpop.eup %1734  ;;  %v1417_v45 = vmul.f32 %v1733_v40, %v1717_v55 }
0x11f8   :  { %v1416_v53 = vmul.f32 %v1735_v10, %v1719_v26 }
0x11f9   :  { %v1428_v0 = vsel %vm1332_vm2, %v1417_v45, 0.0 }
0x11fa   :  { %v1737_v47 = vpop.eup %1736  ;;  %v1426_v48 = vsel %vm1332_vm2, %v1416_v53, 0.0 }
0x11fb   :  { %v1739_v16 = vpop.eup %1738  ;;  %v1427_v49 = vadd.f32 %v1426_v48, %v1425_v46  ;;  %v1419_v21 = vmul.f32 %v1737_v47, %v1721_v51 }
0x11fc   :  { %v1418_v20 = vmul.f32 %v1739_v16, %v1723_v57 }
0x11fd   :  { %v1429_v3 = vadd.f32 %v1428_v0, %v1427_v49  ;;  %v1432_v56 = vsel %vm1332_vm2, %v1419_v21, 0.0 }
0x11fe   :  { %v1430_v4 = vsel %vm1332_vm2, %v1418_v20, 0.0 }
0x11ff   :  { %v1741_v5 = vpop.eup %1740  ;;  %v1431_v6 = vadd.f32 %v1430_v4, %v1429_v3 }
0x1200   :  { %v1420_v59 = vmul.f32 %v1741_v5, %v1725_v28 }
0x1201   :  { %v1433_v60 = vadd.f32 %v1432_v56, %v1431_v6 }
0x1202   :  { %v1434_v1 = vsel %vm1332_vm2, %v1420_v59, 0.0 }
0x1203   :  { %v1435_v52 = vadd.f32 %v1434_v1, %v1433_v60 }
0x1205   :  { %v1436_v25 = vmul.f32 0.125, %v1435_v52 }
0x1207   :  { %1437 = vst.msk [vmem:[%s2411_s9] sm:$0xff] %vm1332_vm2, %v1436_v25 }
0x1208   :  { %1442 = vsyncpa [#allocation3], 1 }
0x1209   :  { %1443 = vsyncpa [#allocation5], 1 }
0x120a   :  { %1444 = vsyncpa [#allocation8], 1 }

</bundles_post_ra>
